<compile_context>
chip_gen: v6e
topology: v6e:2x2x1
jax: 0.10.0
libtpu: 0.0.40
codegen_flags: <defaults>
</compile_context>

<pallas_src>
import functools

import jax
import jax.numpy as jnp
import numpy as np
from jax.experimental import pallas as pl
from jax.experimental.pallas import tpu as pltpu


CONV_TILE_M = 1024          # packed-row tile for conv matmuls
FC_TILE_M = 512             # row tile for fused FC head
VMEM_LIMIT = 48 * 1024 * 1024   # within v7x 64 MiB; fine on v5e/v6e


def _round_up(v, m):
    return (v + m - 1) // m * m


# ---------------------------------------------------------------------------
# Pallas kernel: out = [relu](x @ w + b); bf16 operands, fp32 accumulate
# ---------------------------------------------------------------------------
def _matmul_bias_kernel(x_ref, w_ref, b_ref, o_ref, *, relu):
    acc = jnp.dot(x_ref[...], w_ref[...], preferred_element_type=jnp.float32)
    acc = acc + b_ref[...]                      # (1, N) f32 broadcasts over rows
    if relu:
        acc = jnp.maximum(acc, 0.0)
    o_ref[...] = acc.astype(o_ref.dtype)


def matmul_bias(x, w, b_row, *, relu, out_dtype, tile_m):
    """x: (M, K) bf16, w: (K, N) bf16, b_row: (1, N) f32.  N multiple of 128."""
    M, K = x.shape
    K2, N = w.shape
    assert K == K2, (K, K2)
    tm = min(tile_m, M)                 # tile_m is a multiple of 16 (bf16 rule);
                                        # if M < tile_m the block equals the full dim
    return pl.pallas_call(
        functools.partial(_matmul_bias_kernel, relu=relu),
        out_shape=jax.ShapeDtypeStruct((M, N), out_dtype),
        grid=(pl.cdiv(M, tm),),
        in_specs=[
            pl.BlockSpec((tm, K), lambda i: (i, 0)),   # activation tile (pipelined)
            pl.BlockSpec((K, N), lambda i: (0, 0)),    # weight, grid-invariant
            pl.BlockSpec((1, N), lambda i: (0, 0)),    # bias row, grid-invariant
        ],
        out_specs=pl.BlockSpec((tm, N), lambda i: (i, 0)),
        compiler_params=pltpu.CompilerParams(
            dimension_semantics=("parallel",),         # megacore sharding over rows
            vmem_limit_bytes=VMEM_LIMIT,
        ),
    )(x, w, b_row)


# ---------------------------------------------------------------------------
# Fused FC head: q = relu(x @ w1 + b1) @ w2 + b2  (hidden 512 stays in VMEM)
# ---------------------------------------------------------------------------
def _fused_fc_kernel(x_ref, w1_ref, b1_ref, w2_ref, b2_ref, o_ref):
    h = jnp.dot(x_ref[...], w1_ref[...], preferred_element_type=jnp.float32)
    h = jnp.maximum(h + b1_ref[...], 0.0).astype(jnp.bfloat16)
    q = jnp.dot(h, w2_ref[...], preferred_element_type=jnp.float32) + b2_ref[...]
    o_ref[...] = q.astype(o_ref.dtype)


def fused_fc(x, w1, b1, w2, b2, *, tile_m=FC_TILE_M):
    """x: (M, K) bf16, w1: (K, 512) bf16, w2: (512, Npad) bf16; biases f32 rows."""
    M, K = x.shape
    K1, H = w1.shape
    H2, N = w2.shape
    assert K == K1 and H == H2, (K, K1, H, H2)
    tm = min(tile_m, M)
    return pl.pallas_call(
        _fused_fc_kernel,
        out_shape=jax.ShapeDtypeStruct((M, N), jnp.float32),
        grid=(pl.cdiv(M, tm),),
        in_specs=[
            pl.BlockSpec((tm, K), lambda i: (i, 0)),
            pl.BlockSpec((K, H), lambda i: (0, 0)),
            pl.BlockSpec((1, H), lambda i: (0, 0)),
            pl.BlockSpec((H, N), lambda i: (0, 0)),
            pl.BlockSpec((1, N), lambda i: (0, 0)),
        ],
        out_specs=pl.BlockSpec((tm, N), lambda i: (i, 0)),
        compiler_params=pltpu.CompilerParams(
            dimension_semantics=("parallel",),
            vmem_limit_bytes=VMEM_LIMIT,
        ),
    )(x, w1, b1, w2, b2)


# ---------------------------------------------------------------------------
# Conv2d (+ReLU) via NHWC im2col + lane-dense packed Pallas matmul
# ---------------------------------------------------------------------------
def _im2col(x, kh, kw, stride, channels_last):
    """Patch matrix (N*Ho*Wo, kh*kw*C), feature order (kh, kw, C)."""
    if channels_last:
        N, H, W, C = x.shape
    else:
        N, C, H, W = x.shape
    Ho = (H - kh) // stride + 1
    Wo = (W - kw) // stride + 1
    cols = []
    for i in range(kh):
        for j in range(kw):
            if channels_last:
                sl = x[:, i:i + stride * Ho:stride, j:j + stride * Wo:stride, :]
            else:
                sl = x[:, :, i:i + stride * Ho:stride, j:j + stride * Wo:stride]
                sl = sl.transpose(0, 2, 3, 1)          # fused into the materialize
            cols.append(sl)
    col = jnp.stack(cols, axis=3)                      # (N, Ho, Wo, kh*kw, C)
    return col.reshape(N * Ho * Wo, kh * kw * C), N, Ho, Wo


def conv2d_relu(x, w_packed, b_packed, kh, kw, stride, out_ch, pack,
                channels_last=True):
    """x: NHWC (or NCHW for the first layer) bf16.
    w_packed: (pack*kh*kw*C, pack*out_ch=128) bf16 block-diagonal weight.
    b_packed: (1, 128) f32 (bias tiled `pack` times).
    Returns NHWC (N, Ho, Wo, out_ch) bf16."""
    col, N, Ho, Wo = _im2col(x, kh, kw, stride, channels_last)
    M, K = col.shape
    Mp = _round_up(M, pack)
    if Mp != M:                                        # rare tiny edge pad
        col = jnp.pad(col, ((0, Mp - M), (0, 0)))
    col = col.reshape(Mp // pack, pack * K)            # lane-dense packed rows
    out = matmul_bias(col, w_packed, b_packed, relu=True,
                      out_dtype=jnp.bfloat16, tile_m=CONV_TILE_M)  # (Mp/pack, 128)
    out = out.reshape(Mp, out_ch)[:M].reshape(N, Ho, Wo, out_ch)
    return out


# ---------------------------------------------------------------------------
# Parameter init (PyTorch layout) + one-time preparation to kernel layout
# ---------------------------------------------------------------------------
def _conv_dims(input_dim):
    _, H, W = input_dim
    h1, w1 = (H - 8) // 4 + 1, (W - 8) // 4 + 1
    h2, w2 = (h1 - 4) // 2 + 1, (w1 - 4) // 2 + 1
    h3, w3 = h2 - 2, w2 - 2
    return h3, w3


def init_params(key, input_dim, output_dim):
    C, _, _ = input_dim
    h3, w3 = _conv_dims(input_dim)
    conv_out = 64 * h3 * w3

    def uniform(k, shape, fan_in):
        bound = 1.0 / jnp.sqrt(fan_in)
        return jax.random.uniform(k, shape, jnp.float32, -bound, bound)

    ks = jax.random.split(key, 10)
    p = {}
    p["w1"] = uniform(ks[0], (32, C, 8, 8), C * 8 * 8)
    p["b1"] = uniform(ks[1], (32,), C * 8 * 8)
    p["w2"] = uniform(ks[2], (64, 32, 4, 4), 32 * 4 * 4)
    p["b2"] = uniform(ks[3], (64,), 32 * 4 * 4)
    p["w3"] = uniform(ks[4], (64, 64, 3, 3), 64 * 3 * 3)
    p["b3"] = uniform(ks[5], (64,), 64 * 3 * 3)
    p["fc1_w"] = uniform(ks[6], (512, conv_out), conv_out)
    p["fc1_b"] = uniform(ks[7], (512,), conv_out)
    p["fc2_w"] = uniform(ks[8], (output_dim, 512), 512)
    p["fc2_b"] = uniform(ks[9], (512,), 512)[:output_dim] * 0 + uniform(ks[9], (output_dim,), 512)
    return p


def prepare_params(p, input_dim, output_dim):
    """One-time conversion to the matmul-ready layout the kernels consume."""
    h3, w3 = _conv_dims(input_dim)

    def pack_conv(w_torch, pack, scale=1.0):
        # (O,C,kh,kw) -> (kh,kw,C,O) flattened -> block-diagonal (pack*K, pack*O)
        O = w_torch.shape[0]
        wk = jnp.transpose(w_torch, (2, 3, 1, 0)).reshape(-1, O) * scale
        K = wk.shape[0]
        wp = jnp.zeros((pack * K, pack * O), wk.dtype)
        for t in range(pack):
            wp = wp.at[t * K:(t + 1) * K, t * O:(t + 1) * O].set(wk)
        return wp.astype(jnp.bfloat16)

    def pack_bias(b, pack):
        return jnp.tile(b.reshape(1, -1).astype(jnp.float32), (1, pack))

    q = {}
    q["w1"] = pack_conv(p["w1"], 4, 1.0 / 255.0)       # fold x/255 into conv1
    q["b1"] = pack_bias(p["b1"], 4)
    q["w2"] = pack_conv(p["w2"], 2)
    q["b2"] = pack_bias(p["b2"], 2)
    q["w3"] = pack_conv(p["w3"], 2)
    q["b3"] = pack_bias(p["b3"], 2)

    # fc1: permute columns from PyTorch NCHW-flatten order to NHWC-flatten order
    perm = np.arange(64 * h3 * w3).reshape(64, h3, w3).transpose(1, 2, 0).reshape(-1)
    q["fc1_w"] = p["fc1_w"][:, perm].T.astype(jnp.bfloat16)       # (conv_out, 512)
    q["fc1_b"] = p["fc1_b"].reshape(1, -1).astype(jnp.float32)

    # fc2: zero-pad output columns to a lane-dense multiple of 128
    n_pad = _round_up(output_dim, 128)
    fc2_w = jnp.zeros((512, n_pad), jnp.float32).at[:, :output_dim].set(p["fc2_w"].T)
    fc2_b = jnp.zeros((1, n_pad), jnp.float32).at[0, :output_dim].set(p["fc2_b"])
    q["fc2_w"] = fc2_w.astype(jnp.bfloat16)
    q["fc2_b"] = fc2_b
    return q


# ---------------------------------------------------------------------------
# DQN forward
# ---------------------------------------------------------------------------
def dqn_forward(params, x, output_dim):
    # x: (N, C, H, W), uint8 or float in [0, 255]; 1/255 folded into params["w1"].
    x = x.astype(jnp.bfloat16)                         # bf16 activations end-to-end
    h = conv2d_relu(x, params["w1"], params["b1"], 8, 8, 4, 32, 4,
                    channels_last=False)               # reads NCHW, emits NHWC
    h = conv2d_relu(h, params["w2"], params["b2"], 4, 4, 2, 64, 2)
    h = conv2d_relu(h, params["w3"], params["b3"], 3, 3, 1, 64, 2)
    flat = h.reshape(h.shape[0], -1)                   # NHWC flatten; fc1_w pre-permuted
    q = fused_fc(flat, params["fc1_w"], params["fc1_b"],
                 params["fc2_w"], params["fc2_b"])
    return q[:, :output_dim]


if __name__ == "__main__":
    # Smallest valid spatial for this conv stack: 36x36 -> 8 -> 3 -> 1
    batch, channels, spatial = 2, 4, 36
    input_dim = (channels, spatial, spatial)
    output_dim = 5

    key = jax.random.PRNGKey(0)
    pkey, xkey = jax.random.split(key)
    torch_layout_params = init_params(pkey, input_dim, output_dim)
    params = prepare_params(torch_layout_params, input_dim, output_dim)  # one-time prep

    x = jax.random.uniform(xkey, (batch,) + input_dim, jnp.float32, 0.0, 255.0)

    fwd = jax.jit(functools.partial(dqn_forward, output_dim=output_dim))
    q = fwd(params, x)
    jax.block_until_ready(q)
    assert q.shape == (batch, output_dim), q.shape
    print("KERNEL_OK")
</pallas_src>

<mosaic_0001>
module attributes {stable_mosaic.version = 11 : i64} {
  func.func @_matmul_bias_kernel(%arg0: i32, %arg1: memref<32x1024xbf16, #tpu.memory_space<vmem>>, %arg2: memref<1024x128xbf16, #tpu.memory_space<vmem>>, %arg3: memref<1x128xf32, #tpu.memory_space<vmem>>, %arg4: memref<32x128xbf16, #tpu.memory_space<vmem>>) attributes {dimension_semantics = [#tpu.dimension_semantics<parallel>], iteration_bounds = array<i64: 1>, scalar_prefetch = 0 : i64, scratch_operands = 0 : i64, tpu.core_type = #tpu.core_type<tc>, window_params = [{transform_indices = @transform_0, window_bounds = array<i64: 32, 1024>}, {pipeline_mode = #tpu.pipeline_mode<synchronous>, transform_indices = @transform_1, window_bounds = array<i64: 1024, 128>}, {pipeline_mode = #tpu.pipeline_mode<synchronous>, transform_indices = @transform_2, window_bounds = array<i64: 1, 128>}, {transform_indices = @transform_3, window_bounds = array<i64: 32, 128>}]} {
    %c0 = arith.constant 0 : index
    %c0_0 = arith.constant 0 : index
    %0 = vector.load %arg1[%c0, %c0_0] : memref<32x1024xbf16, #tpu.memory_space<vmem>>, vector<32x1024xbf16>
    %c0_1 = arith.constant 0 : index
    %c0_2 = arith.constant 0 : index
    %1 = vector.load %arg2[%c0_1, %c0_2] : memref<1024x128xbf16, #tpu.memory_space<vmem>>, vector<1024x128xbf16>
    %cst = arith.constant dense<0.000000e+00> : vector<32x128xf32>
    %2 = tpu.matmul %0, %1, %cst {dimension_numbers = #tpu.dot_dimension_numbers<[1], [0], [0], [1], [0, 0, 1, 1], [], []>} : vector<32x1024xbf16>, vector<1024x128xbf16>, vector<32x128xf32> -> vector<32x128xf32>
    %c0_3 = arith.constant 0 : index
    %c0_4 = arith.constant 0 : index
    %3 = vector.load %arg3[%c0_3, %c0_4] : memref<1x128xf32, #tpu.memory_space<vmem>>, vector<1x128xf32>
    %4 = vector.broadcast %3 : vector<1x128xf32> to vector<32x128xf32>
    %5 = arith.addf %2, %4 : vector<32x128xf32>
    %cst_5 = arith.constant 0.000000e+00 : f32
    %6 = vector.broadcast %cst_5 : f32 to vector<32x128xf32>
    %7 = arith.maximumf %5, %6 : vector<32x128xf32>
    %8 = arith.truncf %7 : vector<32x128xf32> to vector<32x128xbf16>
    %c0_6 = arith.constant 0 : index
    %c0_7 = arith.constant 0 : index
    %9 = vector.load %arg4[%c0_6, %c0_7] : memref<32x128xbf16, #tpu.memory_space<vmem>>, vector<32x128xbf16>
    tpu.vector_store %arg4[%c0_6, %c0_7], %8 {strides = array<i32>} : memref<32x128xbf16, #tpu.memory_space<vmem>>, vector<32x128xbf16>,
    return
  }
  func.func @transform_0(%arg0: i32) -> (i32, i32) {
    %c0_i32 = arith.constant 0 : i32
    %c0_i32_0 = arith.constant 0 : i32
    return %arg0, %c0_i32 : i32, i32
  }
  func.func @transform_1(%arg0: i32) -> (i32, i32) {
    %c0_i32 = arith.constant 0 : i32
    %c0_i32_0 = arith.constant 0 : i32
    %c0_i32_1 = arith.constant 0 : i32
    return %c0_i32, %c0_i32_0 : i32, i32
  }
  func.func @transform_2(%arg0: i32) -> (i32, i32) {
    %c0_i32 = arith.constant 0 : i32
    %c0_i32_0 = arith.constant 0 : i32
    %c0_i32_1 = arith.constant 0 : i32
    return %c0_i32, %c0_i32_0 : i32, i32
  }
  func.func @transform_3(%arg0: i32) -> (i32, i32) {
    %c0_i32 = arith.constant 0 : i32
    %c0_i32_0 = arith.constant 0 : i32
    return %arg0, %c0_i32 : i32, i32
  }
}

module attributes {stable_mosaic.version = 11 : i64} {
  func.func @_matmul_bias_kernel(%arg0: i32, %arg1: memref<9x1024xbf16, #tpu.memory_space<vmem>>, %arg2: memref<1024x128xbf16, #tpu.memory_space<vmem>>, %arg3: memref<1x128xf32, #tpu.memory_space<vmem>>, %arg4: memref<9x128xbf16, #tpu.memory_space<vmem>>) attributes {dimension_semantics = [#tpu.dimension_semantics<parallel>], iteration_bounds = array<i64: 1>, scalar_prefetch = 0 : i64, scratch_operands = 0 : i64, tpu.core_type = #tpu.core_type<tc>, window_params = [{transform_indices = @transform_0, window_bounds = array<i64: 9, 1024>}, {pipeline_mode = #tpu.pipeline_mode<synchronous>, transform_indices = @transform_1, window_bounds = array<i64: 1024, 128>}, {pipeline_mode = #tpu.pipeline_mode<synchronous>, transform_indices = @transform_2, window_bounds = array<i64: 1, 128>}, {transform_indices = @transform_3, window_bounds = array<i64: 9, 128>}]} {
    %c0 = arith.constant 0 : index
    %c0_0 = arith.constant 0 : index
    %0 = vector.load %arg1[%c0, %c0_0] : memref<9x1024xbf16, #tpu.memory_space<vmem>>, vector<9x1024xbf16>
    %c0_1 = arith.constant 0 : index
    %c0_2 = arith.constant 0 : index
    %1 = vector.load %arg2[%c0_1, %c0_2] : memref<1024x128xbf16, #tpu.memory_space<vmem>>, vector<1024x128xbf16>
    %cst = arith.constant dense<0.000000e+00> : vector<9x128xf32>
    %2 = tpu.matmul %0, %1, %cst {dimension_numbers = #tpu.dot_dimension_numbers<[1], [0], [0], [1], [0, 0, 1, 1], [], []>} : vector<9x1024xbf16>, vector<1024x128xbf16>, vector<9x128xf32> -> vector<9x128xf32>
    %c0_3 = arith.constant 0 : index
    %c0_4 = arith.constant 0 : index
    %3 = vector.load %arg3[%c0_3, %c0_4] : memref<1x128xf32, #tpu.memory_space<vmem>>, vector<1x128xf32>
    %4 = vector.broadcast %3 : vector<1x128xf32> to vector<9x128xf32>
    %5 = arith.addf %2, %4 : vector<9x128xf32>
    %cst_5 = arith.constant 0.000000e+00 : f32
    %6 = vector.broadcast %cst_5 : f32 to vector<9x128xf32>
    %7 = arith.maximumf %5, %6 : vector<9x128xf32>
    %8 = arith.truncf %7 : vector<9x128xf32> to vector<9x128xbf16>
    %c0_6 = arith.constant 0 : index
    %c0_7 = arith.constant 0 : index
    %9 = vector.load %arg4[%c0_6, %c0_7] : memref<9x128xbf16, #tpu.memory_space<vmem>>, vector<9x128xbf16>
    tpu.vector_store %arg4[%c0_6, %c0_7], %8 {strides = array<i32>} : memref<9x128xbf16, #tpu.memory_space<vmem>>, vector<9x128xbf16>,
    return
  }
  func.func @transform_0(%arg0: i32) -> (i32, i32) {
    %c0_i32 = arith.constant 0 : i32
    %c0_i32_0 = arith.constant 0 : i32
    return %arg0, %c0_i32 : i32, i32
  }
  func.func @transform_1(%arg0: i32) -> (i32, i32) {
    %c0_i32 = arith.constant 0 : i32
    %c0_i32_0 = arith.constant 0 : i32
    %c0_i32_1 = arith.constant 0 : i32
    return %c0_i32, %c0_i32_0 : i32, i32
  }
  func.func @transform_2(%arg0: i32) -> (i32, i32) {
    %c0_i32 = arith.constant 0 : i32
    %c0_i32_0 = arith.constant 0 : i32
    %c0_i32_1 = arith.constant 0 : i32
    return %c0_i32, %c0_i32_0 : i32, i32
  }
  func.func @transform_3(%arg0: i32) -> (i32, i32) {
    %c0_i32 = arith.constant 0 : i32
    %c0_i32_0 = arith.constant 0 : i32
    return %arg0, %c0_i32 : i32, i32
  }
}

module attributes {stable_mosaic.version = 11 : i64} {
  func.func @_matmul_bias_kernel(%arg0: i32, %arg1: memref<1x1152xbf16, #tpu.memory_space<vmem>>, %arg2: memref<1152x128xbf16, #tpu.memory_space<vmem>>, %arg3: memref<1x128xf32, #tpu.memory_space<vmem>>, %arg4: memref<1x128xbf16, #tpu.memory_space<vmem>>) attributes {dimension_semantics = [#tpu.dimension_semantics<parallel>], iteration_bounds = array<i64: 1>, scalar_prefetch = 0 : i64, scratch_operands = 0 : i64, tpu.core_type = #tpu.core_type<tc>, window_params = [{transform_indices = @transform_0, window_bounds = array<i64: 1, 1152>}, {pipeline_mode = #tpu.pipeline_mode<synchronous>, transform_indices = @transform_1, window_bounds = array<i64: 1152, 128>}, {pipeline_mode = #tpu.pipeline_mode<synchronous>, transform_indices = @transform_2, window_bounds = array<i64: 1, 128>}, {transform_indices = @transform_3, window_bounds = array<i64: 1, 128>}]} {
    %c0 = arith.constant 0 : index
    %c0_0 = arith.constant 0 : index
    %0 = vector.load %arg1[%c0, %c0_0] : memref<1x1152xbf16, #tpu.memory_space<vmem>>, vector<1x1152xbf16>
    %c0_1 = arith.constant 0 : index
    %c0_2 = arith.constant 0 : index
    %1 = vector.load %arg2[%c0_1, %c0_2] : memref<1152x128xbf16, #tpu.memory_space<vmem>>, vector<1152x128xbf16>
    %cst = arith.constant dense<0.000000e+00> : vector<1x128xf32>
    %2 = tpu.matmul %0, %1, %cst {dimension_numbers = #tpu.dot_dimension_numbers<[1], [0], [0], [1], [0, 0, 1, 1], [], []>} : vector<1x1152xbf16>, vector<1152x128xbf16>, vector<1x128xf32> -> vector<1x128xf32>
    %c0_3 = arith.constant 0 : index
    %c0_4 = arith.constant 0 : index
    %3 = vector.load %arg3[%c0_3, %c0_4] : memref<1x128xf32, #tpu.memory_space<vmem>>, vector<1x128xf32>
    %4 = arith.addf %2, %3 : vector<1x128xf32>
    %cst_5 = arith.constant 0.000000e+00 : f32
    %5 = vector.broadcast %cst_5 : f32 to vector<1x128xf32>
    %6 = arith.maximumf %4, %5 : vector<1x128xf32>
    %7 = arith.truncf %6 : vector<1x128xf32> to vector<1x128xbf16>
    %c0_6 = arith.constant 0 : index
    %c0_7 = arith.constant 0 : index
    %8 = vector.load %arg4[%c0_6, %c0_7] : memref<1x128xbf16, #tpu.memory_space<vmem>>, vector<1x128xbf16>
    tpu.vector_store %arg4[%c0_6, %c0_7], %7 {strides = array<i32>} : memref<1x128xbf16, #tpu.memory_space<vmem>>, vector<1x128xbf16>,
    return
  }
  func.func @transform_0(%arg0: i32) -> (i32, i32) {
    %c0_i32 = arith.constant 0 : i32
    %c0_i32_0 = arith.constant 0 : i32
    return %arg0, %c0_i32 : i32, i32
  }
  func.func @transform_1(%arg0: i32) -> (i32, i32) {
    %c0_i32 = arith.constant 0 : i32
    %c0_i32_0 = arith.constant 0 : i32
    %c0_i32_1 = arith.constant 0 : i32
    return %c0_i32, %c0_i32_0 : i32, i32
  }
  func.func @transform_2(%arg0: i32) -> (i32, i32) {
    %c0_i32 = arith.constant 0 : i32
    %c0_i32_0 = arith.constant 0 : i32
    %c0_i32_1 = arith.constant 0 : i32
    return %c0_i32, %c0_i32_0 : i32, i32
  }
  func.func @transform_3(%arg0: i32) -> (i32, i32) {
    %c0_i32 = arith.constant 0 : i32
    %c0_i32_0 = arith.constant 0 : i32
    return %arg0, %c0_i32 : i32, i32
  }
}

module attributes {stable_mosaic.version = 11 : i64} {
  func.func @_fused_fc_kernel(%arg0: i32, %arg1: memref<2x64xbf16, #tpu.memory_space<vmem>>, %arg2: memref<64x512xbf16, #tpu.memory_space<vmem>>, %arg3: memref<1x512xf32, #tpu.memory_space<vmem>>, %arg4: memref<512x128xbf16, #tpu.memory_space<vmem>>, %arg5: memref<1x128xf32, #tpu.memory_space<vmem>>, %arg6: memref<2x128xf32, #tpu.memory_space<vmem>>) attributes {dimension_semantics = [#tpu.dimension_semantics<parallel>], iteration_bounds = array<i64: 1>, scalar_prefetch = 0 : i64, scratch_operands = 0 : i64, tpu.core_type = #tpu.core_type<tc>, window_params = [{transform_indices = @transform_0, window_bounds = array<i64: 2, 64>}, {pipeline_mode = #tpu.pipeline_mode<synchronous>, transform_indices = @transform_1, window_bounds = array<i64: 64, 512>}, {pipeline_mode = #tpu.pipeline_mode<synchronous>, transform_indices = @transform_2, window_bounds = array<i64: 1, 512>}, {pipeline_mode = #tpu.pipeline_mode<synchronous>, transform_indices = @transform_3, window_bounds = array<i64: 512, 128>}, {pipeline_mode = #tpu.pipeline_mode<synchronous>, transform_indices = @transform_4, window_bounds = array<i64: 1, 128>}, {transform_indices = @transform_5, window_bounds = array<i64: 2, 128>}]} {
    %c0 = arith.constant 0 : index
    %c0_0 = arith.constant 0 : index
    %0 = vector.load %arg1[%c0, %c0_0] : memref<2x64xbf16, #tpu.memory_space<vmem>>, vector<2x64xbf16>
    %c0_1 = arith.constant 0 : index
    %c0_2 = arith.constant 0 : index
    %1 = vector.load %arg2[%c0_1, %c0_2] : memref<64x512xbf16, #tpu.memory_space<vmem>>, vector<64x512xbf16>
    %cst = arith.constant dense<0.000000e+00> : vector<2x512xf32>
    %2 = tpu.matmul %0, %1, %cst {dimension_numbers = #tpu.dot_dimension_numbers<[1], [0], [0], [1], [0, 0, 1, 1], [], []>} : vector<2x64xbf16>, vector<64x512xbf16>, vector<2x512xf32> -> vector<2x512xf32>
    %c0_3 = arith.constant 0 : index
    %c0_4 = arith.constant 0 : index
    %3 = vector.load %arg3[%c0_3, %c0_4] : memref<1x512xf32, #tpu.memory_space<vmem>>, vector<1x512xf32>
    %4 = vector.broadcast %3 : vector<1x512xf32> to vector<2x512xf32>
    %5 = arith.addf %2, %4 : vector<2x512xf32>
    %cst_5 = arith.constant 0.000000e+00 : f32
    %6 = vector.broadcast %cst_5 : f32 to vector<2x512xf32>
    %7 = arith.maximumf %5, %6 : vector<2x512xf32>
    %8 = arith.truncf %7 : vector<2x512xf32> to vector<2x512xbf16>
    %c0_6 = arith.constant 0 : index
    %c0_7 = arith.constant 0 : index
    %9 = vector.load %arg4[%c0_6, %c0_7] : memref<512x128xbf16, #tpu.memory_space<vmem>>, vector<512x128xbf16>
    %cst_8 = arith.constant dense<0.000000e+00> : vector<2x128xf32>
    %10 = tpu.matmul %8, %9, %cst_8 {dimension_numbers = #tpu.dot_dimension_numbers<[1], [0], [0], [1], [0, 0, 1, 1], [], []>} : vector<2x512xbf16>, vector<512x128xbf16>, vector<2x128xf32> -> vector<2x128xf32>
    %c0_9 = arith.constant 0 : index
    %c0_10 = arith.constant 0 : index
    %11 = vector.load %arg5[%c0_9, %c0_10] : memref<1x128xf32, #tpu.memory_space<vmem>>, vector<1x128xf32>
    %12 = vector.broadcast %11 : vector<1x128xf32> to vector<2x128xf32>
    %13 = arith.addf %10, %12 : vector<2x128xf32>
    %c0_11 = arith.constant 0 : index
    %c0_12 = arith.constant 0 : index
    %14 = vector.load %arg6[%c0_11, %c0_12] : memref<2x128xf32, #tpu.memory_space<vmem>>, vector<2x128xf32>
    tpu.vector_store %arg6[%c0_11, %c0_12], %13 {strides = array<i32>} : memref<2x128xf32, #tpu.memory_space<vmem>>, vector<2x128xf32>,
    return
  }
  func.func @transform_0(%arg0: i32) -> (i32, i32) {
    %c0_i32 = arith.constant 0 : i32
    %c0_i32_0 = arith.constant 0 : i32
    return %arg0, %c0_i32 : i32, i32
  }
  func.func @transform_1(%arg0: i32) -> (i32, i32) {
    %c0_i32 = arith.constant 0 : i32
    %c0_i32_0 = arith.constant 0 : i32
    %c0_i32_1 = arith.constant 0 : i32
    return %c0_i32, %c0_i32_0 : i32, i32
  }
  func.func @transform_2(%arg0: i32) -> (i32, i32) {
    %c0_i32 = arith.constant 0 : i32
    %c0_i32_0 = arith.constant 0 : i32
    %c0_i32_1 = arith.constant 0 : i32
    return %c0_i32, %c0_i32_0 : i32, i32
  }
  func.func @transform_3(%arg0: i32) -> (i32, i32) {
    %c0_i32 = arith.constant 0 : i32
    %c0_i32_0 = arith.constant 0 : i32
    %c0_i32_1 = arith.constant 0 : i32
    return %c0_i32, %c0_i32_0 : i32, i32
  }
  func.func @transform_4(%arg0: i32) -> (i32, i32) {
    %c0_i32 = arith.constant 0 : i32
    %c0_i32_0 = arith.constant 0 : i32
    %c0_i32_1 = arith.constant 0 : i32
    return %c0_i32, %c0_i32_0 : i32, i32
  }
  func.func @transform_5(%arg0: i32) -> (i32, i32) {
    %c0_i32 = arith.constant 0 : i32
    %c0_i32_0 = arith.constant 0 : i32
    return %arg0, %c0_i32 : i32, i32
  }
}

</mosaic_0001>

<bundles_post_ra>
// kernel: dqn_forward.4
= control target key start
LH: loop header
LB: loop body
LE: loop exit
PB: predicated region body
PF: predicated region fallthrough
CT: control target
= control target key end

     0   :  { %s1399_s1 = inlined_call_operand.vmem [shape: bf16[1024,128], index: 1, kind: input, shape index: {}]   ;;  %s1400_s0 = inlined_call_operand.vmem [shape: bf16[32,1024], index: 0, kind: input, shape index: {}]   ;;  %s1401_s2 = inlined_call_operand.vmem [shape: f32[1,128], index: 2, kind: input, shape index: {}]   ;;  %s1402_s3 = inlined_call_operand.vmem [shape: bf16[32,128], index: 3, kind: output, shape index: {}]  }
   0x1   :  { %v1066_v0 = vld [vmem:[%s1399_s1 + $0x78] sm:$0xff]   ;;  %v1070_v4 = vld [vmem:[%s1399_s1 + $0x70] sm:$0xff]   ;;  %v1074_v8 = vld [vmem:[%s1399_s1 + $0x68] sm:$0xff]  }
   0x2   :  { %v1067_v1 = vld [vmem:[%s1399_s1 + $0xf8] sm:$0xff]   ;;  %954 = vmatprep.subr.bf16.mxu0 %v1066_v0  ;;  %v1071_v5 = vld [vmem:[%s1399_s1 + $0xf0] sm:$0xff]   ;;  %v1075_v9 = vld [vmem:[%s1399_s1 + $0xe8] sm:$0xff]  }
   0x3   :  { %v1068_v2 = vld [vmem:[%s1399_s1 + $0x38] sm:$0xff]   ;;  %982 = vmatprep.subr.bf16.mxu1 %v1067_v1  ;;  %v1072_v6 = vld [vmem:[%s1399_s1 + $0x30] sm:$0xff]   ;;  %v1076_v10 = vld [vmem:[%s1399_s1 + $0x28] sm:$0xff]  }
   0x4   :  { %v1069_v3 = vld [vmem:[%s1399_s1 + $0xb8] sm:$0xff]   ;;  %955 = vmatpush3.bf16.msra.mxu0 %v1068_v2  ;;  %v1073_v7 = vld [vmem:[%s1399_s1 + $0xb0] sm:$0xff]   ;;  %v1077_v11 = vld [vmem:[%s1399_s1 + $0xa8] sm:$0xff]  }
   0x5   :  { %983 = vmatpush3.bf16.msra.mxu1 %v1069_v3  ;;  %956 = vmatprep.subr.bf16.mxu0 %v1070_v4  ;;  %v1078_v12 = vld [vmem:[%s1399_s1 + $0x60] sm:$0xff]   ;;  %v1082_v16 = vld [vmem:[%s1399_s1 + $0x58] sm:$0xff]   ;;  %v1086_v20 = vld [vmem:[%s1399_s1 + $0x50] sm:$0xff]  }
   0x6   :  { %984 = vmatprep.subr.bf16.mxu1 %v1071_v5  ;;  %v1079_v13 = vld [vmem:[%s1399_s1 + $0xe0] sm:$0xff]   ;;  %v1083_v17 = vld [vmem:[%s1399_s1 + $0xd8] sm:$0xff]   ;;  %v1087_v21 = vld [vmem:[%s1399_s1 + $0xd0] sm:$0xff]  }
   0x7   :  { %v1080_v14 = vld [vmem:[%s1399_s1 + $0x20] sm:$0xff]   ;;  %v1084_v18 = vld [vmem:[%s1399_s1 + $0x18] sm:$0xff]   ;;  %v1088_v22 = vld [vmem:[%s1399_s1 + $0x10] sm:$0xff]  }
   0x8   :  { %957 = vmatpush3.bf16.msra.mxu0 %v1072_v6  ;;  %v1081_v15 = vld [vmem:[%s1399_s1 + $0xa0] sm:$0xff]   ;;  %v1085_v19 = vld [vmem:[%s1399_s1 + $0x98] sm:$0xff]   ;;  %v1089_v23 = vld [vmem:[%s1399_s1 + $0x90] sm:$0xff]  }
   0x9   :  { %985 = vmatpush3.bf16.msra.mxu1 %v1073_v7  ;;  %958 = vmatprep.subr.bf16.mxu0 %v1074_v8  ;;  %v1090_v24 = vld [vmem:[%s1399_s1 + $0x48] sm:$0xff]   ;;  %v1094_v28 = vld [vmem:[%s1399_s1 + $0x40] sm:$0xff]   ;;  %v1098_v40 = vld [vmem:[%s1399_s1 + $0x178] sm:$0xff]  }
   0xa   :  { %986 = vmatprep.subr.bf16.mxu1 %v1075_v9  ;;  %v1091_v25 = vld [vmem:[%s1399_s1 + $0xc8] sm:$0xff]   ;;  %v1095_v29 = vld [vmem:[%s1399_s1 + $0xc0] sm:$0xff]   ;;  %v1099_v41 = vld [vmem:[%s1399_s1 + $0x1f8] sm:$0xff]  }
   0xb   :  { %v1092_v26 = vld [vmem:[%s1399_s1 + $0x8] sm:$0xff]   ;;  %v1096_v30 = vld [vmem:[%s1399_s1] sm:$0xff]   ;;  %v1100_v42 = vld [vmem:[%s1399_s1 + $0x138] sm:$0xff]  }
   0xc   :  { %959 = vmatpush3.bf16.msra.mxu0 %v1076_v10  ;;  %v1093_v27 = vld [vmem:[%s1399_s1 + $0x88] sm:$0xff]   ;;  %v1097_v31 = vld [vmem:[%s1399_s1 + $0x80] sm:$0xff]   ;;  %v1101_v43 = vld [vmem:[%s1399_s1 + $0x1b8] sm:$0xff]  }
   0xd   :  { %987 = vmatpush3.bf16.msra.mxu1 %v1077_v11  ;;  %960 = vmatprep.subr.bf16.mxu0 %v1078_v12  ;;  %v15_v32 = vld [vmem:[%s1400_s0] sm:$0xff]  ;;  %v16_v34 = vld [vmem:[%s1400_s0 + $0x8] sm:$0xff]  ;;  %v1102_v44 = vld [vmem:[%s1399_s1 + $0x170] sm:$0xff]  }
   0xe   :  { %988 = vmatprep.subr.bf16.mxu1 %v1079_v13  ;;  %v19_v33 = vld [vmem:[%s1400_s0 + $0x20] sm:$0xff]  ;;  %v20_v37 = vld [vmem:[%s1400_s0 + $0x28] sm:$0xff]  ;;  %v1103_v45 = vld [vmem:[%s1399_s1 + $0x1f0] sm:$0xff]  }
   0xf   :  { %v855_v35 = vcombine.low %v15_v32, %v19_v33  ;;  %v856_v36 = vcombine.high %v15_v32, %v19_v33  ;;  %v857_v38 = vcombine.low %v16_v34, %v20_v37  ;;  %v858_v39 = vcombine.high %v16_v34, %v20_v37  ;;  %v1104_v46 = vld [vmem:[%s1399_s1 + $0x130] sm:$0xff]   ;;  %v1106_v48 = vld [vmem:[%s1399_s1 + $0x168] sm:$0xff]   ;;  %v1110_v52 = vld [vmem:[%s1399_s1 + $0x160] sm:$0xff]  }
  0x10   :  { %961 = vmatpush3.bf16.msra.mxu0 %v1080_v14  ;;  %v1105_v47 = vld [vmem:[%s1399_s1 + $0x1b0] sm:$0xff]   ;;  %v1107_v49 = vld [vmem:[%s1399_s1 + $0x1e8] sm:$0xff]   ;;  %v1111_v53 = vld [vmem:[%s1399_s1 + $0x1e0] sm:$0xff]  }
  0x11   :  { %989 = vmatpush3.bf16.msra.mxu1 %v1081_v15  ;;  %962 = vmatprep.subr.bf16.mxu0 %v1082_v16  ;;  %v1108_v50 = vld [vmem:[%s1399_s1 + $0x128] sm:$0xff]   ;;  %v1112_v54 = vld [vmem:[%s1399_s1 + $0x120] sm:$0xff]   ;;  %v1114_v56 = vld [vmem:[%s1399_s1 + $0x158] sm:$0xff]  }
  0x12   :  { %990 = vmatprep.subr.bf16.mxu1 %v1083_v17  ;;  %662 = vmatprep.mubr.bf16.mxu0 %v856_v36  ;;  %v1109_v51 = vld [vmem:[%s1399_s1 + $0x1a8] sm:$0xff]   ;;  %v1113_v55 = vld [vmem:[%s1399_s1 + $0x1a0] sm:$0xff]   ;;  %v1115_v57 = vld [vmem:[%s1399_s1 + $0x1d8] sm:$0xff]  }
  0x13   :  { %711 = vmatprep.mubr.bf16.mxu1 %v858_v39  ;;  %v23_v58 = vld [vmem:[%s1400_s0 + $0x40] sm:$0xff]  ;;  %v1116_v61 = vld [vmem:[%s1399_s1 + $0x118] sm:$0xff]   ;;  %v24_v0 = vld [vmem:[%s1400_s0 + $0x48] sm:$0xff] }
  0x14   :  { %963 = vmatpush3.bf16.msra.mxu0 %v1084_v18  ;;  %v27_v59 = vld [vmem:[%s1400_s0 + $0x60] sm:$0xff]  ;;  %v1117_v63 = vld [vmem:[%s1399_s1 + $0x198] sm:$0xff]   ;;  %v28_v1 = vld [vmem:[%s1400_s0 + $0x68] sm:$0xff] }
  0x15   :  { %991 = vmatpush3.bf16.msra.mxu1 %v1085_v19  ;;  %964 = vmatprep.subr.bf16.mxu0 %v1086_v20  ;;  %v864_v60 = vcombine.high %v23_v58, %v27_v59  ;;  %v863_v62 = vcombine.low %v23_v58, %v27_v59  ;;  %v866_v2 = vcombine.high %v24_v0, %v28_v1  ;;  %v1118_v4 = vld [vmem:[%s1399_s1 + $0x150] sm:$0xff]   ;;  %v1122_v8 = vld [vmem:[%s1399_s1 + $0x148] sm:$0xff]   ;;  %v1126_v12 = vld [vmem:[%s1399_s1 + $0x140] sm:$0xff]  }
  0x16   :  { %992 = vmatprep.subr.bf16.mxu1 %v1087_v21  ;;  %v865_v3 = vcombine.low %v24_v0, %v28_v1  ;;  %v1119_v5 = vld [vmem:[%s1399_s1 + $0x1d0] sm:$0xff]   ;;  %v1123_v9 = vld [vmem:[%s1399_s1 + $0x1c8] sm:$0xff]   ;;  %v1127_v13 = vld [vmem:[%s1399_s1 + $0x1c0] sm:$0xff]  }
  0x17   :  { %v1120_v6 = vld [vmem:[%s1399_s1 + $0x110] sm:$0xff]   ;;  %v1124_v10 = vld [vmem:[%s1399_s1 + $0x108] sm:$0xff]   ;;  %v1128_v14 = vld [vmem:[%s1399_s1 + $0x100] sm:$0xff]  }
  0x18   :  { %965 = vmatpush3.bf16.msra.mxu0 %v1088_v22  ;;  %v1121_v7 = vld [vmem:[%s1399_s1 + $0x190] sm:$0xff]   ;;  %v1125_v11 = vld [vmem:[%s1399_s1 + $0x188] sm:$0xff]   ;;  %v1129_v15 = vld [vmem:[%s1399_s1 + $0x180] sm:$0xff]  }
  0x19   :  { %993 = vmatpush3.bf16.msra.mxu1 %v1089_v23  ;;  %966 = vmatprep.subr.bf16.mxu0 %v1090_v24  ;;  %v17_v16 = vld [vmem:[%s1400_s0 + $0x10] sm:$0xff]  ;;  %v18_v18 = vld [vmem:[%s1400_s0 + $0x18] sm:$0xff] }
  0x1a   :  { %994 = vmatprep.subr.bf16.mxu1 %v1091_v25  ;;  %v21_v17 = vld [vmem:[%s1400_s0 + $0x30] sm:$0xff]  ;;  %v22_v19 = vld [vmem:[%s1400_s0 + $0x38] sm:$0xff] }
  0x1b   :  { %v859_v20 = vcombine.low %v17_v16, %v21_v17  ;;  %v860_v21 = vcombine.high %v17_v16, %v21_v17  ;;  %v861_v22 = vcombine.low %v18_v18, %v22_v19  ;;  %v862_v23 = vcombine.high %v18_v18, %v22_v19  ;;  %v25_v24 = vld [vmem:[%s1400_s0 + $0x50] sm:$0xff] }
  0x1c   :  { %967 = vmatpush3.bf16.msra.mxu0 %v1092_v26  ;;  %v29_v25 = vld [vmem:[%s1400_s0 + $0x70] sm:$0xff]  ;;  %v26_v26 = vld [vmem:[%s1400_s0 + $0x58] sm:$0xff] }
  0x1d   :  { %995 = vmatpush3.bf16.msra.mxu1 %v1093_v27  ;;  %968 = vmatprep.subr.bf16.mxu0 %v1094_v28  ;;  %v868_v27 = vcombine.high %v25_v24, %v29_v25  ;;  %v30_v28 = vld [vmem:[%s1400_s0 + $0x78] sm:$0xff] }
  0x1e   :  { %996 = vmatprep.subr.bf16.mxu1 %v1095_v29  ;;  %v870_v29 = vcombine.high %v26_v26, %v30_v28 }
  0x20   :  { %969 = vmatpush3.bf16.msra.mxu0 %v1096_v30  ;;  %v867_v30 = vcombine.low %v25_v24, %v29_v25 }
  0x21   :  { %997 = vmatpush3.bf16.msra.mxu1 %v1097_v31  ;;  %1010 = vmatprep.subr.bf16.mxu0 %v1098_v40  ;;  %v869_v31 = vcombine.low %v26_v26, %v30_v28 }
  0x22   :  { %1038 = vmatprep.subr.bf16.mxu1 %v1099_v41 }
  0x23   :  { %663 = vmatmul.mubr.bf16.vlgmr.msra.gmra.mxu0 %v855_v35 }
  0x24   :  { %712 = vmatmul.mubr.bf16.vlgmr.msra.gmra.mxu1 %v857_v38  ;;  %1011 = vmatpush3.bf16.msra.mxu0 %v1100_v42 }
  0x25   :  { %1039 = vmatpush3.bf16.msra.mxu1 %v1101_v43  ;;  %1012 = vmatprep.subr.bf16.mxu0 %v1102_v44 }
  0x26   :  { %1040 = vmatprep.subr.bf16.mxu1 %v1103_v45  ;;  %670 = vmatprep.mubr.bf16.mxu0 %v864_v60 }
  0x27   :  { %719 = vmatprep.mubr.bf16.mxu1 %v866_v2 }
  0x28   :  { %1013 = vmatpush3.bf16.msra.mxu0 %v1104_v46 }
  0x29   :  { %1041 = vmatpush3.bf16.msra.mxu1 %v1105_v47  ;;  %1014 = vmatprep.subr.bf16.mxu0 %v1106_v48  ;;  %v854_v47 = vld [vmem:[%s1401_s2] ss:$0 sm:$0xff] }
  0x2a   :  { %1042 = vmatprep.subr.bf16.mxu1 %v1107_v49 }
  0x2b   :  { %671 = vmatmul.mubr.bf16.gmra.mxu0 %v863_v62 }
  0x2c   :  { %1015 = vmatpush3.bf16.msra.mxu0 %v1108_v50  ;;  %720 = vmatmul.mubr.bf16.gmra.mxu1 %v865_v3 }
  0x2d   :  { %1043 = vmatpush3.bf16.msra.mxu1 %v1109_v51  ;;  %1016 = vmatprep.subr.bf16.mxu0 %v1110_v52 }
  0x2e   :  { %1044 = vmatprep.subr.bf16.mxu1 %v1111_v53  ;;  %760 = vmatprep.mubr.bf16.mxu0 %v860_v21 }
  0x2f   :  { %809 = vmatprep.mubr.bf16.mxu1 %v862_v23 }
  0x30   :  { %1017 = vmatpush3.bf16.msra.mxu0 %v1112_v54 }
  0x31   :  { %1045 = vmatpush3.bf16.msra.mxu1 %v1113_v55  ;;  %1018 = vmatprep.subr.bf16.mxu0 %v1114_v56 }
  0x32   :  { %1046 = vmatprep.subr.bf16.mxu1 %v1115_v57 }
  0x34   :  { %1019 = vmatpush3.bf16.msra.mxu0 %v1116_v61 }
  0x35   :  { %1047 = vmatpush3.bf16.msra.mxu1 %v1117_v63  ;;  %1020 = vmatprep.subr.bf16.mxu0 %v1118_v4 }
  0x36   :  { %1048 = vmatprep.subr.bf16.mxu1 %v1119_v5 }
  0x38   :  { %1021 = vmatpush3.bf16.msra.mxu0 %v1120_v6 }
  0x39   :  { %1049 = vmatpush3.bf16.msra.mxu1 %v1121_v7  ;;  %1022 = vmatprep.subr.bf16.mxu0 %v1122_v8 }
  0x3a   :  { %1050 = vmatprep.subr.bf16.mxu1 %v1123_v9 }
  0x3c   :  { %1023 = vmatpush3.bf16.msra.mxu0 %v1124_v10 }
  0x3d   :  { %1051 = vmatpush3.bf16.msra.mxu1 %v1125_v11  ;;  %1024 = vmatprep.subr.bf16.mxu0 %v1126_v12 }
  0x3e   :  { %1052 = vmatprep.subr.bf16.mxu1 %v1127_v13 }
  0x40   :  { %1025 = vmatpush3.bf16.msra.mxu0 %v1128_v14 }
  0x41   :  { %1053 = vmatpush3.bf16.msra.mxu1 %v1129_v15 }
  0x43   :  { %761 = vmatmul.mubr.bf16.vlgmr.msra.gmra.mxu0 %v859_v20 }
  0x44   :  { %810 = vmatmul.mubr.bf16.vlgmr.msra.gmra.mxu1 %v861_v22  ;;  %768 = vmatprep.mubr.bf16.mxu0 %v868_v27 }
  0x45   :  { %817 = vmatprep.mubr.bf16.mxu1 %v870_v29 }
  0x4b   :  { %769 = vmatmul.mubr.bf16.gmra.mxu0 %v867_v30 }
  0x4c   :  { %818 = vmatmul.mubr.bf16.gmra.mxu1 %v869_v31 }
  0xe3   :  { %v970_v32 = vpop.f32.mrf.mxu0 }
  0xe4   :  { %v998_v33 = vpop.f32.mrf.mxu1 }
  0xe5   :  { %v971_v34 = vpop.f32.mrf.mxu0 }
  0xe6   :  { %v999_v35 = vpop.f32.mrf.mxu1  ;;  %v972_v46 = vadd.f32 %v971_v34, %v970_v32 }
  0xe7   :  { %v973_v36 = vpop.f32.mrf.mxu0  ;;  %v1000_v51 = vadd.f32 %v999_v35, %v998_v33 }
  0xe8   :  { %v1001_v37 = vpop.f32.mrf.mxu1  ;;  %v665_v50 = vadd.f32 %v972_v46, %v854_v47 }
  0xe9   :  { %v974_v38 = vpop.f32.mrf.mxu0 }
  0xea   :  { %v1002_v39 = vpop.f32.mrf.mxu1  ;;  %v975_v52 = vadd.f32 %v974_v38, %v973_v36  ;;  %v714_v58 = vadd.f32 %v1000_v51, %v665_v50 }
  0xeb   :  { %v976_v40 = vpop.f32.mrf.mxu0  ;;  %v1003_v63 = vadd.f32 %v1002_v39, %v1001_v37 }
  0xec   :  { %v1004_v41 = vpop.f32.mrf.mxu1  ;;  %v668_v59 = vadd.f32 %v975_v52, %v854_v47 }
  0xed   :  { %v977_v42 = vpop.f32.mrf.mxu0 }
  0xee   :  { %v1005_v43 = vpop.f32.mrf.mxu1  ;;  %v978_v55 = vadd.f32 %v977_v42, %v976_v40  ;;  %v717_v5 = vadd.f32 %v1003_v63, %v668_v59 }
  0xef   :  { %v979_v44 = vpop.f32.mrf.mxu0  ;;  %v1006_v2 = vadd.f32 %v1005_v43, %v1004_v41 }
  0xf0   :  { %v1007_v45 = vpop.f32.mrf.mxu1  ;;  %v673_v1 = vadd.f32 %v978_v55, %v854_v47 }
  0xf1   :  { %v980_v48 = vpop.f32.mrf.mxu0 }
  0xf2   :  { %v1008_v49 = vpop.f32.mrf.mxu1  ;;  %v981_v6 = vadd.f32 %v980_v48, %v979_v44  ;;  %v722_v14 = vadd.f32 %v1006_v2, %v673_v1 }
  0xf3   :  { %v1009_v18 = vadd.f32 %v1008_v49, %v1007_v45 }
  0xf4   :  { %v676_v17 = vadd.f32 %v981_v6, %v854_v47 }
  0xf6   :  { %v725_v28 = vadd.f32 %v1009_v18, %v676_v17 }
 0x103   :  { %v1026_v53 = vpop.f32.mrf.mxu0 }
 0x104   :  { %v1054_v54 = vpop.f32.mrf.mxu1 }
 0x105   :  { %v1027_v56 = vpop.f32.mrf.mxu0 }
 0x106   :  { %v1055_v57 = vpop.f32.mrf.mxu1  ;;  %v1028_v60 = vadd.f32 %v1027_v56, %v1026_v53 }
 0x107   :  { %v1029_v61 = vpop.f32.mrf.mxu0  ;;  %v1056_v7 = vadd.f32 %v1055_v57, %v1054_v54 }
 0x108   :  { %v1057_v62 = vpop.f32.mrf.mxu1  ;;  %v763_v0 = vadd.f32 %v1028_v60, %v714_v58 }
 0x109   :  { %v1030_v3 = vpop.f32.mrf.mxu0 }
 0x10a   :  { %v1058_v4 = vpop.f32.mrf.mxu1  ;;  %v1031_v8 = vadd.f32 %v1030_v3, %v1029_v61  ;;  %v812_v11 = vadd.f32 %v1056_v7, %v763_v0 }
 0x10b   :  { %v1032_v9 = vpop.f32.mrf.mxu0  ;;  %v1059_v13 = vadd.f32 %v1058_v4, %v1057_v62 }
 0x10c   :  { %v1060_v10 = vpop.f32.mrf.mxu1  ;;  %v766_v12 = vadd.f32 %v1031_v8, %v717_v5  ;;  %v826_v23 = vmax.f32 %v812_v11, 0.0 }
 0x10d   :  { %v1033_v15 = vpop.f32.mrf.mxu0 }
 0x10e   :  { %v1061_v16 = vpop.f32.mrf.mxu1  ;;  %v815_v19 = vadd.f32 %v1059_v13, %v766_v12  ;;  %v1034_v20 = vadd.f32 %v1033_v15, %v1032_v9 }
 0x10f   :  { %v1035_v21 = vpop.f32.mrf.mxu0  ;;  %v1062_v30 = vadd.f32 %v1061_v16, %v1060_v10 }
 0x110   :  { %v1063_v22 = vpop.f32.mrf.mxu1  ;;  %v827_v24 = vmax.f32 %v815_v19, 0.0  ;;  %v771_v25 = vadd.f32 %v1034_v20, %v722_v14 }
 0x111   :  { %v1036_v26 = vpop.f32.mrf.mxu0 }
 0x112   :  { %v1064_v27 = vpop.f32.mrf.mxu1  ;;  %v946_v29 = vpack.c.bf16 %v827_v24, %v826_v23  ;;  %v1037_v31 = vadd.f32 %v1036_v26, %v1035_v21  ;;  %v820_v32 = vadd.f32 %v1062_v30, %v771_v25 }
 0x113   :  { %v1065_v34 = vadd.f32 %v1064_v27, %v1063_v22 }
 0x114   :  { %947 = vst [vmem:[%s1402_s3] sm:$0xff] %v946_v29   ;;  %v774_v33 = vadd.f32 %v1037_v31, %v725_v28  ;;  %v828_v36 = vmax.f32 %v820_v32, 0.0 }
 0x116   :  { %v823_v35 = vadd.f32 %v1065_v34, %v774_v33 }
 0x118   :  { %v829_v37 = vmax.f32 %v823_v35, 0.0 }
 0x11a   :  { %v951_v38 = vpack.c.bf16 %v829_v37, %v828_v36 }
 0x11c   :  { %953 = vst [vmem:[%s1402_s3 + $0x8] sm:$0xff] %v951_v38  }

// kernel: dqn_forward.5
= control target key start
LH: loop header
LB: loop body
LE: loop exit
PB: predicated region body
PF: predicated region fallthrough
CT: control target
= control target key end

     0   :  { %vm757_vm0 = vcmask 1040384   ;;  %vm758_vm1 = vsmask.f32 256  ;;  %s1244_s1 = inlined_call_operand.vmem [shape: bf16[1024,128], index: 1, kind: input, shape index: {}]   ;;  %s1245_s0 = inlined_call_operand.vmem [shape: bf16[9,1024], index: 0, kind: input, shape index: {}]   ;;  %s1246_s2 = inlined_call_operand.vmem [shape: f32[1,128], index: 2, kind: input, shape index: {}]   ;;  %s1247_s3 = inlined_call_operand.vmem [shape: bf16[9,128], index: 3, kind: output, shape index: {}]  }
   0x1   :  { %v932_v0 = vld [vmem:[%s1244_s1 + $0x78] sm:$0xff]   ;;  %v936_v4 = vld [vmem:[%s1244_s1 + $0x70] sm:$0xff]   ;;  %v940_v8 = vld [vmem:[%s1244_s1 + $0x68] sm:$0xff]  }
   0x2   :  { %v933_v1 = vld [vmem:[%s1244_s1 + $0xf8] sm:$0xff]   ;;  %844 = vmatprep.subr.bf16.mxu0 %v932_v0  ;;  %v937_v5 = vld [vmem:[%s1244_s1 + $0xf0] sm:$0xff]   ;;  %v941_v9 = vld [vmem:[%s1244_s1 + $0xe8] sm:$0xff]  }
   0x3   :  { %v934_v2 = vld [vmem:[%s1244_s1 + $0x38] sm:$0xff]   ;;  %866 = vmatprep.subr.bf16.mxu1 %v933_v1  ;;  %v938_v6 = vld [vmem:[%s1244_s1 + $0x30] sm:$0xff]   ;;  %v942_v10 = vld [vmem:[%s1244_s1 + $0x28] sm:$0xff]  }
   0x4   :  { %v935_v3 = vld [vmem:[%s1244_s1 + $0xb8] sm:$0xff]   ;;  %845 = vmatpush3.bf16.msra.mxu0 %v934_v2  ;;  %v939_v7 = vld [vmem:[%s1244_s1 + $0xb0] sm:$0xff]   ;;  %v943_v11 = vld [vmem:[%s1244_s1 + $0xa8] sm:$0xff]  }
   0x5   :  { %867 = vmatpush3.bf16.msra.mxu1 %v935_v3  ;;  %846 = vmatprep.subr.bf16.mxu0 %v936_v4  ;;  %v944_v12 = vld [vmem:[%s1244_s1 + $0x60] sm:$0xff]   ;;  %v948_v16 = vld [vmem:[%s1244_s1 + $0x58] sm:$0xff]   ;;  %v952_v20 = vld [vmem:[%s1244_s1 + $0x50] sm:$0xff]  }
   0x6   :  { %868 = vmatprep.subr.bf16.mxu1 %v937_v5  ;;  %v945_v13 = vld [vmem:[%s1244_s1 + $0xe0] sm:$0xff]   ;;  %v949_v17 = vld [vmem:[%s1244_s1 + $0xd8] sm:$0xff]   ;;  %v953_v21 = vld [vmem:[%s1244_s1 + $0xd0] sm:$0xff]  }
   0x7   :  { %v946_v14 = vld [vmem:[%s1244_s1 + $0x20] sm:$0xff]   ;;  %v950_v18 = vld [vmem:[%s1244_s1 + $0x18] sm:$0xff]   ;;  %v954_v22 = vld [vmem:[%s1244_s1 + $0x10] sm:$0xff]  }
   0x8   :  { %847 = vmatpush3.bf16.msra.mxu0 %v938_v6  ;;  %v947_v15 = vld [vmem:[%s1244_s1 + $0xa0] sm:$0xff]   ;;  %v951_v19 = vld [vmem:[%s1244_s1 + $0x98] sm:$0xff]   ;;  %v955_v23 = vld [vmem:[%s1244_s1 + $0x90] sm:$0xff]  }
   0x9   :  { %869 = vmatpush3.bf16.msra.mxu1 %v939_v7  ;;  %848 = vmatprep.subr.bf16.mxu0 %v940_v8  ;;  %v956_v24 = vld [vmem:[%s1244_s1 + $0x48] sm:$0xff]   ;;  %v960_v28 = vld [vmem:[%s1244_s1 + $0x40] sm:$0xff]   ;;  %v964_v40 = vld [vmem:[%s1244_s1 + $0x178] sm:$0xff]  }
   0xa   :  { %870 = vmatprep.subr.bf16.mxu1 %v941_v9  ;;  %v957_v25 = vld [vmem:[%s1244_s1 + $0xc8] sm:$0xff]   ;;  %v961_v29 = vld [vmem:[%s1244_s1 + $0xc0] sm:$0xff]   ;;  %v965_v41 = vld [vmem:[%s1244_s1 + $0x1f8] sm:$0xff]  }
   0xb   :  { %v958_v26 = vld [vmem:[%s1244_s1 + $0x8] sm:$0xff]   ;;  %v962_v30 = vld [vmem:[%s1244_s1] sm:$0xff]   ;;  %v966_v42 = vld [vmem:[%s1244_s1 + $0x138] sm:$0xff]  }
   0xc   :  { %849 = vmatpush3.bf16.msra.mxu0 %v942_v10  ;;  %v959_v27 = vld [vmem:[%s1244_s1 + $0x88] sm:$0xff]   ;;  %v963_v31 = vld [vmem:[%s1244_s1 + $0x80] sm:$0xff]   ;;  %v967_v43 = vld [vmem:[%s1244_s1 + $0x1b8] sm:$0xff]  }
   0xd   :  { %871 = vmatpush3.bf16.msra.mxu1 %v943_v11  ;;  %850 = vmatprep.subr.bf16.mxu0 %v944_v12  ;;  %v15_v32 = vld [vmem:[%s1245_s0] sm:$0xff]  ;;  %v16_v34 = vld [vmem:[%s1245_s0 + $0x8] sm:$0xff]  ;;  %v968_v44 = vld [vmem:[%s1244_s1 + $0x170] sm:$0xff]  }
   0xe   :  { %872 = vmatprep.subr.bf16.mxu1 %v945_v13  ;;  %v19_v33 = vld [vmem:[%s1245_s0 + $0x20] sm:$0x11]  ;;  %v20_v37 = vld [vmem:[%s1245_s0 + $0x28] sm:$0x11]  ;;  %v969_v45 = vld [vmem:[%s1244_s1 + $0x1f0] sm:$0xff]  }
   0xf   :  { %v768_v35 = vcombine.low %v15_v32, %v19_v33  ;;  %v769_v36 = vcombine.high %v15_v32, %v19_v33  ;;  %v770_v38 = vcombine.low %v16_v34, %v20_v37  ;;  %v771_v39 = vcombine.high %v16_v34, %v20_v37  ;;  %v970_v46 = vld [vmem:[%s1244_s1 + $0x130] sm:$0xff]   ;;  %v972_v48 = vld [vmem:[%s1244_s1 + $0x168] sm:$0xff]   ;;  %v976_v52 = vld [vmem:[%s1244_s1 + $0x160] sm:$0xff]  }
  0x10   :  { %851 = vmatpush3.bf16.msra.mxu0 %v946_v14  ;;  %v971_v47 = vld [vmem:[%s1244_s1 + $0x1b0] sm:$0xff]   ;;  %v973_v49 = vld [vmem:[%s1244_s1 + $0x1e8] sm:$0xff]   ;;  %v977_v53 = vld [vmem:[%s1244_s1 + $0x1e0] sm:$0xff]  }
  0x11   :  { %873 = vmatpush3.bf16.msra.mxu1 %v947_v15  ;;  %852 = vmatprep.subr.bf16.mxu0 %v948_v16  ;;  %v974_v50 = vld [vmem:[%s1244_s1 + $0x128] sm:$0xff]   ;;  %v978_v54 = vld [vmem:[%s1244_s1 + $0x120] sm:$0xff]   ;;  %v980_v56 = vld [vmem:[%s1244_s1 + $0x158] sm:$0xff]  }
  0x12   :  { %874 = vmatprep.subr.bf16.mxu1 %v949_v17  ;;  %614 = vmatprep.mubr.bf16.mxu0 %v769_v36  ;;  %v975_v51 = vld [vmem:[%s1244_s1 + $0x1a8] sm:$0xff]   ;;  %v979_v55 = vld [vmem:[%s1244_s1 + $0x1a0] sm:$0xff]   ;;  %v981_v57 = vld [vmem:[%s1244_s1 + $0x1d8] sm:$0xff]  }
  0x13   :  { %655 = vmatprep.mubr.bf16.mxu1 %v771_v39  ;;  %v982_v58 = vld [vmem:[%s1244_s1 + $0x118] sm:$0xff]   ;;  %v984_v60 = vld [vmem:[%s1244_s1 + $0x150] sm:$0xff]   ;;  %v988_v0 = vld [vmem:[%s1244_s1 + $0x148] sm:$0xff]  }
  0x14   :  { %853 = vmatpush3.bf16.msra.mxu0 %v950_v18  ;;  %v983_v59 = vld [vmem:[%s1244_s1 + $0x198] sm:$0xff]   ;;  %v985_v61 = vld [vmem:[%s1244_s1 + $0x1d0] sm:$0xff]   ;;  %v989_v1 = vld [vmem:[%s1244_s1 + $0x1c8] sm:$0xff]  }
  0x15   :  { %875 = vmatpush3.bf16.msra.mxu1 %v951_v19  ;;  %854 = vmatprep.subr.bf16.mxu0 %v952_v20  ;;  %v986_v62 = vld [vmem:[%s1244_s1 + $0x110] sm:$0xff]   ;;  %v990_v2 = vld [vmem:[%s1244_s1 + $0x108] sm:$0xff]   ;;  %v992_v4 = vld [vmem:[%s1244_s1 + $0x140] sm:$0xff]  }
  0x16   :  { %876 = vmatprep.subr.bf16.mxu1 %v953_v21  ;;  %v987_v63 = vld [vmem:[%s1244_s1 + $0x190] sm:$0xff]   ;;  %v991_v3 = vld [vmem:[%s1244_s1 + $0x188] sm:$0xff]   ;;  %v993_v5 = vld [vmem:[%s1244_s1 + $0x1c0] sm:$0xff]  }
  0x17   :  { %v994_v6 = vld [vmem:[%s1244_s1 + $0x100] sm:$0xff]   ;;  %v17_v8 = vld [vmem:[%s1245_s0 + $0x10] sm:$0xff]  ;;  %v18_v12 = vld [vmem:[%s1245_s0 + $0x18] sm:$0xff] }
  0x18   :  { %855 = vmatpush3.bf16.msra.mxu0 %v954_v22  ;;  %v995_v7 = vld [vmem:[%s1244_s1 + $0x180] sm:$0xff]   ;;  %v21_v9 = vld [vmem:[%s1245_s0 + $0x30] sm:$0x11]  ;;  %v22_v13 = vld [vmem:[%s1245_s0 + $0x38] sm:$0x11] }
  0x19   :  { %877 = vmatpush3.bf16.msra.mxu1 %v955_v23  ;;  %856 = vmatprep.subr.bf16.mxu0 %v956_v24  ;;  %v772_v10 = vcombine.low %v17_v8, %v21_v9  ;;  %v773_v11 = vcombine.high %v17_v8, %v21_v9  ;;  %v774_v14 = vcombine.low %v18_v12, %v22_v13  ;;  %v767_v23 = vld [vmem:[%s1246_s2] ss:$0 sm:$0xff]  ;;  %vm759_vm2 = vmand %vm757_vm0, %vm758_vm1 }
  0x1a   :  { %878 = vmatprep.subr.bf16.mxu1 %v957_v25  ;;  %v775_v15 = vcombine.high %v18_v12, %v22_v13 }
  0x1c   :  { %857 = vmatpush3.bf16.msra.mxu0 %v958_v26 }
  0x1d   :  { %879 = vmatpush3.bf16.msra.mxu1 %v959_v27  ;;  %858 = vmatprep.subr.bf16.mxu0 %v960_v28 }
  0x1e   :  { %880 = vmatprep.subr.bf16.mxu1 %v961_v29 }
  0x20   :  { %859 = vmatpush3.bf16.msra.mxu0 %v962_v30 }
  0x21   :  { %881 = vmatpush3.bf16.msra.mxu1 %v963_v31  ;;  %888 = vmatprep.subr.bf16.mxu0 %v964_v40 }
  0x22   :  { %910 = vmatprep.subr.bf16.mxu1 %v965_v41 }
  0x23   :  { %615 = vmatmul.mubr.bf16.vlgmr.msra.gmra.mxu0 %v768_v35 }
  0x24   :  { %656 = vmatmul.mubr.bf16.vlgmr.msra.gmra.mxu1 %v770_v38  ;;  %889 = vmatpush3.bf16.msra.mxu0 %v966_v42 }
  0x25   :  { %911 = vmatpush3.bf16.msra.mxu1 %v967_v43  ;;  %890 = vmatprep.subr.bf16.mxu0 %v968_v44 }
  0x26   :  { %912 = vmatprep.subr.bf16.mxu1 %v969_v45  ;;  %696 = vmatprep.mubr.bf16.mxu0 %v773_v11 }
  0x27   :  { %737 = vmatprep.mubr.bf16.mxu1 %v775_v15 }
  0x28   :  { %891 = vmatpush3.bf16.msra.mxu0 %v970_v46 }
  0x29   :  { %913 = vmatpush3.bf16.msra.mxu1 %v971_v47  ;;  %892 = vmatprep.subr.bf16.mxu0 %v972_v48 }
  0x2a   :  { %914 = vmatprep.subr.bf16.mxu1 %v973_v49 }
  0x2c   :  { %893 = vmatpush3.bf16.msra.mxu0 %v974_v50 }
  0x2d   :  { %915 = vmatpush3.bf16.msra.mxu1 %v975_v51  ;;  %894 = vmatprep.subr.bf16.mxu0 %v976_v52  ;;  %v760_v52 = vld [vmem:[%s1247_s3 + $0x4] sm:$0x1] }
  0x2e   :  { %916 = vmatprep.subr.bf16.mxu1 %v977_v53 }
  0x30   :  { %895 = vmatpush3.bf16.msra.mxu0 %v978_v54 }
  0x31   :  { %917 = vmatpush3.bf16.msra.mxu1 %v979_v55  ;;  %896 = vmatprep.subr.bf16.mxu0 %v980_v56 }
  0x32   :  { %918 = vmatprep.subr.bf16.mxu1 %v981_v57 }
  0x34   :  { %897 = vmatpush3.bf16.msra.mxu0 %v982_v58 }
  0x35   :  { %919 = vmatpush3.bf16.msra.mxu1 %v983_v59  ;;  %898 = vmatprep.subr.bf16.mxu0 %v984_v60 }
  0x36   :  { %920 = vmatprep.subr.bf16.mxu1 %v985_v61 }
  0x38   :  { %899 = vmatpush3.bf16.msra.mxu0 %v986_v62 }
  0x39   :  { %921 = vmatpush3.bf16.msra.mxu1 %v987_v63  ;;  %900 = vmatprep.subr.bf16.mxu0 %v988_v0 }
  0x3a   :  { %922 = vmatprep.subr.bf16.mxu1 %v989_v1 }
  0x3c   :  { %901 = vmatpush3.bf16.msra.mxu0 %v990_v2 }
  0x3d   :  { %923 = vmatpush3.bf16.msra.mxu1 %v991_v3  ;;  %902 = vmatprep.subr.bf16.mxu0 %v992_v4 }
  0x3e   :  { %924 = vmatprep.subr.bf16.mxu1 %v993_v5 }
  0x40   :  { %903 = vmatpush3.bf16.msra.mxu0 %v994_v6 }
  0x41   :  { %925 = vmatpush3.bf16.msra.mxu1 %v995_v7 }
  0x43   :  { %697 = vmatmul.mubr.bf16.vlgmr.msra.gmra.mxu0 %v772_v10 }
  0x44   :  { %738 = vmatmul.mubr.bf16.vlgmr.msra.gmra.mxu1 %v774_v14 }
  0xe3   :  { %v860_v16 = vpop.f32.mrf.mxu0 }
  0xe4   :  { %v882_v17 = vpop.f32.mrf.mxu1 }
  0xe5   :  { %v861_v18 = vpop.f32.mrf.mxu0 }
  0xe6   :  { %v883_v19 = vpop.f32.mrf.mxu1  ;;  %v862_v21 = vadd.f32 %v861_v18, %v860_v16 }
  0xe7   :  { %v863_v20 = vpop.f32.mrf.mxu0  ;;  %v884_v26 = vadd.f32 %v883_v19, %v882_v17 }
  0xe8   :  { %v885_v22 = vpop.f32.mrf.mxu1  ;;  %v617_v25 = vadd.f32 %v862_v21, %v767_v23 }
  0xe9   :  { %v864_v24 = vpop.f32.mrf.mxu0 }
  0xea   :  { %v865_v27 = vadd.f32 %v864_v24, %v863_v20  ;;  %v886_v28 = vpop.f32.mrf.mxu1  ;;  %v658_v32 = vadd.f32 %v884_v26, %v617_v25 }
  0xeb   :  { %v887_v37 = vadd.f32 %v886_v28, %v885_v22 }
  0xec   :  { %v620_v33 = vadd.f32 %v865_v27, %v767_v23 }
  0xee   :  { %v661_v42 = vadd.f32 %v887_v37, %v620_v33 }
 0x103   :  { %v904_v29 = vpop.f32.mrf.mxu0 }
 0x104   :  { %v926_v30 = vpop.f32.mrf.mxu1 }
 0x105   :  { %v905_v31 = vpop.f32.mrf.mxu0 }
 0x106   :  { %v906_v34 = vadd.f32 %v905_v31, %v904_v29  ;;  %v927_v35 = vpop.f32.mrf.mxu1 }
 0x107   :  { %v907_v36 = vpop.f32.mrf.mxu0  ;;  %v928_v39 = vadd.f32 %v927_v35, %v926_v30 }
 0x108   :  { %v699_v38 = vadd.f32 %v906_v34, %v658_v32  ;;  %v929_v40 = vpop.f32.mrf.mxu1 }
 0x109   :  { %v908_v41 = vpop.f32.mrf.mxu0 }
 0x10a   :  { %v740_v43 = vadd.f32 %v928_v39, %v699_v38  ;;  %v909_v44 = vadd.f32 %v908_v41, %v907_v36  ;;  %v930_v45 = vpop.f32.mrf.mxu1 }
 0x10b   :  { %v931_v48 = vadd.f32 %v930_v45, %v929_v40 }
 0x10c   :  { %v746_v46 = vmax.f32 %v740_v43, 0.0  ;;  %v702_v47 = vadd.f32 %v909_v44, %v661_v42 }
 0x10e   :  { %v842_v49 = vpack.c.bf16 %v746_v46, %v746_v46  ;;  %v743_v50 = vadd.f32 %v931_v48, %v702_v47 }
 0x110   :  { %756 = vst [vmem:[%s1247_s3] sm:$0xf] %v842_v49  ;;  %v747_v51 = vmax.f32 %v743_v50, 0.0 }
 0x112   :  { %v843_v53 = vpack.c.bf16 %v747_v51, %v747_v51 }
 0x114   :  { %v761_v54 = vsel %vm759_vm2, %v843_v53, %v760_v52 }
 0x115   :  { %762 = vst [vmem:[%s1247_s3 + $0x4] sm:$0x1] %v761_v54 }

// kernel: dqn_forward.6
= control target key start
LH: loop header
LB: loop body
LE: loop exit
PB: predicated region body
PF: predicated region fallthrough
CT: control target
= control target key end

     0   :  { %v1146_v21 = vmov 1966171168   ;;  %v168_v23 = vlaneseq  ;;  %vm1148_vm0 = vmmov 0   ;;  %vm870_vm1 = vcmask 1040384   ;;  %s1414_s1 = inlined_call_operand.vmem [shape: bf16[1152,128], index: 1, kind: input, shape index: {}]   ;;  %s1415_s0 = inlined_call_operand.vmem [shape: bf16[1,1152], index: 0, kind: input, shape index: {}]   ;;  %s1416_s2 = inlined_call_operand.vmem [shape: f32[1,128], index: 2, kind: input, shape index: {}]   ;;  %s1417_s3 = inlined_call_operand.vmem [shape: bf16[1,128], index: 3, kind: output, shape index: {}]  }
   0x1   :  { %v1073_v0 = vld [vmem:[%s1414_s1 + $0x78] sm:$0xff]   ;;  %v1077_v4 = vld [vmem:[%s1414_s1 + $0x70] sm:$0xff]   ;;  %v1081_v8 = vld [vmem:[%s1414_s1 + $0x68] sm:$0xff]   ;;  %v166_v22 = vunpack.c.l.s4 %v1146_v21  ;;  %vm871_vm2 = vsmask.f32 256 }
   0x2   :  { %v1074_v1 = vld [vmem:[%s1414_s1 + $0x38] sm:$0xff]   ;;  %953 = vmatprep.subr.bf16.mxu0 %v1073_v0  ;;  %v1078_v5 = vld [vmem:[%s1414_s1 + $0x30] sm:$0xff]   ;;  %v1082_v9 = vld [vmem:[%s1414_s1 + $0x28] sm:$0xff]   ;;  %v169_v29 = vshrl.u32 %v168_v23, 7 }
   0x3   :  { %v1075_v2 = vld [vmem:[%s1414_s1 + $0xf8] sm:$0xff]   ;;  %954 = vmatpush3.bf16.msra.mxu0 %v1074_v1  ;;  %v1079_v6 = vld [vmem:[%s1414_s1 + $0xf0] sm:$0xff]   ;;  %v1083_v10 = vld [vmem:[%s1414_s1 + $0xe8] sm:$0xff]   ;;  %v167_v28 = vunpack.c.0.s8 %v166_v22 }
   0x4   :  { %v1076_v3 = vld [vmem:[%s1414_s1 + $0xb8] sm:$0xff]   ;;  %975 = vmatprep.subr.bf16.mxu1 %v1075_v2  ;;  %955 = vmatprep.subr.bf16.mxu0 %v1077_v4  ;;  %v1080_v7 = vld [vmem:[%s1414_s1 + $0xb0] sm:$0xff]   ;;  %v1084_v11 = vld [vmem:[%s1414_s1 + $0xa8] sm:$0xff]  }
   0x5   :  { %976 = vmatpush3.bf16.msra.mxu1 %v1076_v3  ;;  %v1085_v12 = vld [vmem:[%s1414_s1 + $0x60] sm:$0xff]   ;;  %v1089_v16 = vld [vmem:[%s1414_s1 + $0x58] sm:$0xff]   ;;  %v1093_v20 = vld [vmem:[%s1414_s1 + $0x50] sm:$0xff]   ;;  %v1256_v34 = vsub.s32 %v167_v28, %v169_v29 }
   0x6   :  { %977 = vmatprep.subr.bf16.mxu1 %v1079_v6  ;;  %v1086_v13 = vld [vmem:[%s1414_s1 + $0x20] sm:$0xff]   ;;  %v1090_v17 = vld [vmem:[%s1414_s1 + $0x18] sm:$0xff]   ;;  %v1094_v24 = vld [vmem:[%s1414_s1 + $0x10] sm:$0xff]  }
   0x7   :  { %956 = vmatpush3.bf16.msra.mxu0 %v1078_v5  ;;  %v1087_v14 = vld [vmem:[%s1414_s1 + $0xe0] sm:$0xff]   ;;  %v1091_v18 = vld [vmem:[%s1414_s1 + $0xd8] sm:$0xff]   ;;  %v1095_v25 = vld [vmem:[%s1414_s1 + $0xd0] sm:$0xff]  }
   0x8   :  { %957 = vmatprep.subr.bf16.mxu0 %v1081_v8  ;;  %v1088_v15 = vld [vmem:[%s1414_s1 + $0xa0] sm:$0xff]   ;;  %v1092_v19 = vld [vmem:[%s1414_s1 + $0x98] sm:$0xff]   ;;  %v1096_v26 = vld [vmem:[%s1414_s1 + $0x90] sm:$0xff]  }
   0x9   :  { %978 = vmatpush3.bf16.msra.mxu1 %v1080_v7  ;;  %v1097_v27 = vld [vmem:[%s1414_s1 + $0x48] sm:$0xff]   ;;  %v1101_v33 = vld [vmem:[%s1414_s1 + $0x40] sm:$0xff]   ;;  %v1106_v41 = vld [vmem:[%s1414_s1 + $0x178] sm:$0xff]  }
   0xa   :  { %979 = vmatprep.subr.bf16.mxu1 %v1083_v10  ;;  %v1098_v30 = vld [vmem:[%s1414_s1 + $0x8] sm:$0xff]   ;;  %v1102_v35 = vld [vmem:[%s1414_s1] sm:$0xff]   ;;  %v1108_v45 = vld [vmem:[%s1414_s1 + $0x1f8] sm:$0xff]  }
   0xb   :  { %958 = vmatpush3.bf16.msra.mxu0 %v1082_v9  ;;  %v1099_v31 = vld [vmem:[%s1414_s1 + $0xc8] sm:$0xff]   ;;  %v1103_v36 = vld [vmem:[%s1414_s1 + $0xc0] sm:$0xff]   ;;  %v1107_v47 = vld [vmem:[%s1414_s1 + $0x138] sm:$0xff]  }
   0xc   :  { %959 = vmatprep.subr.bf16.mxu0 %v1085_v12  ;;  %v1100_v32 = vld [vmem:[%s1414_s1 + $0x88] sm:$0xff]   ;;  %v15_v37 = vld [vmem:[%s1415_s0] sm:$0xff]  ;;  %v1110_v50 = vld [vmem:[%s1414_s1 + $0x170] sm:$0xff]  }
   0xd   :  { %980 = vmatpush3.bf16.msra.mxu1 %v1084_v11  ;;  %v164_v38 = vcombine.high %v15_v37, %v15_v37  ;;  %v171_v39 = vrot.slane %v15_v37, %v1256_v34  ;;  %v1105_v40 = vld [vmem:[%s1414_s1 + $0x80] sm:$0xff]   ;;  %v1109_v52 = vld [vmem:[%s1414_s1 + $0x1b8] sm:$0xff]   ;;  %v1112_v54 = vld [vmem:[%s1414_s1 + $0x1f0] sm:$0xff]  }
   0xe   :  { %981 = vmatprep.subr.bf16.mxu1 %v1087_v14  ;;  %v1111_v55 = vld [vmem:[%s1414_s1 + $0x130] sm:$0xff]   ;;  %v1114_v57 = vld [vmem:[%s1414_s1 + $0x168] sm:$0xff]   ;;  %v1118_v61 = vld [vmem:[%s1414_s1 + $0x160] sm:$0xff]  }
   0xf   :  { %960 = vmatpush3.bf16.msra.mxu0 %v1086_v13  ;;  %v179_v42 = vcombine.high %v171_v39, %v171_v39  ;;  %v187_v43 = vrot.slane %v171_v39, %v1256_v34  ;;  %v1276_v44 = vrot.slane %v164_v38, %v1256_v34  ;;  %v1113_v58 = vld [vmem:[%s1414_s1 + $0x1b0] sm:$0xff]   ;;  %v1116_v59 = vld [vmem:[%s1414_s1 + $0x1e8] sm:$0xff]   ;;  %v1120_v63 = vld [vmem:[%s1414_s1 + $0x1e0] sm:$0xff]  }
  0x10   :  { %961 = vmatprep.subr.bf16.mxu0 %v1089_v16  ;;  %v1115_v60 = vld [vmem:[%s1414_s1 + $0x128] sm:$0xff]   ;;  %v1119_v0 = vld [vmem:[%s1414_s1 + $0x120] sm:$0xff]   ;;  %v1122_v1 = vld [vmem:[%s1414_s1 + $0x158] sm:$0xff]  }
  0x11   :  { %982 = vmatpush3.bf16.msra.mxu1 %v1088_v15  ;;  %v201_v46 = vrot.slane %v179_v42, %v1256_v34  ;;  %v180_v48 = vcombine.high %v1276_v44, %v1276_v44  ;;  %v209_v49 = vcombine.high %v187_v43, %v187_v43  ;;  %v1117_v62 = vld [vmem:[%s1414_s1 + $0x1a8] sm:$0xff]   ;;  %v1121_v2 = vld [vmem:[%s1414_s1 + $0x1a0] sm:$0xff]   ;;  %v1124_v3 = vld [vmem:[%s1414_s1 + $0x1d8] sm:$0xff]  }
  0x12   :  { %983 = vmatprep.subr.bf16.mxu1 %v1091_v18  ;;  %v1123_v4 = vld [vmem:[%s1414_s1 + $0x118] sm:$0xff]   ;;  %v1126_v5 = vld [vmem:[%s1414_s1 + $0x150] sm:$0xff]   ;;  %v1130_v9 = vld [vmem:[%s1414_s1 + $0x148] sm:$0xff]  }
  0x13   :  { %962 = vmatpush3.bf16.msra.mxu0 %v1090_v17  ;;  %700 = vmatprep.mubr.bf16.mxu0 %v201_v46  ;;  %v211_v51 = vcombine.high %v201_v46, %v201_v46  ;;  %v208_v53 = vrot.slane %v180_v48, %v1256_v34  ;;  %v1125_v6 = vld [vmem:[%s1414_s1 + $0x198] sm:$0xff]   ;;  %v1128_v7 = vld [vmem:[%s1414_s1 + $0x1d0] sm:$0xff]   ;;  %v1132_v11 = vld [vmem:[%s1414_s1 + $0x1c8] sm:$0xff]   ;;  %v194_v17 = vrot.slane %v1276_v44, %v1256_v34 }
  0x14   :  { %963 = vmatprep.subr.bf16.mxu0 %v1093_v20  ;;  %v1127_v8 = vld [vmem:[%s1414_s1 + $0x110] sm:$0xff]   ;;  %v1131_v12 = vld [vmem:[%s1414_s1 + $0x108] sm:$0xff]   ;;  %v1134_v13 = vld [vmem:[%s1414_s1 + $0x140] sm:$0xff]   ;;  %v1147_v20 = vmov 0.0  }
  0x15   :  { %984 = vmatpush3.bf16.msra.mxu1 %v1092_v19  ;;  %740 = vmatprep.mubr.bf16.mxu1 %v211_v51  ;;  %v212_v56 = vcombine.high %v208_v53, %v208_v53  ;;  %v1129_v10 = vld [vmem:[%s1414_s1 + $0x190] sm:$0xff]   ;;  %v1133_v14 = vld [vmem:[%s1414_s1 + $0x188] sm:$0xff]   ;;  %v1136_v15 = vld [vmem:[%s1414_s1 + $0x1c0] sm:$0xff]   ;;  %v210_v21 = vcombine.high %v194_v17, %v194_v17 }
  0x16   :  { %985 = vmatprep.subr.bf16.mxu1 %v1095_v25  ;;  %v1135_v16 = vld [vmem:[%s1414_s1 + $0x100] sm:$0xff]   ;;  %v1138_v19 = vld [vmem:[%s1414_s1 + $0x238] sm:$0xff]   ;;  %v1139_v22 = vld [vmem:[%s1414_s1 + $0x230] sm:$0xff]  }
  0x17   :  { %964 = vmatpush3.bf16.msra.mxu0 %v1094_v24  ;;  %v1137_v18 = vld [vmem:[%s1414_s1 + $0x180] sm:$0xff]   ;;  %v880_v23 = vld.sshfl [vmem:[%s1415_s0 + $0x8] sm:$0x1 pattern:$0x75316420]  ;;  %v1143_v28 = vld [vmem:[%s1414_s1 + $0x210] sm:$0xff]  }
  0x18   :  { %965 = vmatprep.subr.bf16.mxu0 %v1097_v27  ;;  %v226_v24 = vrot.slane %v880_v23, %v1256_v34  ;;  %v1140_v25 = vld [vmem:[%s1414_s1 + $0x228] sm:$0xff]   ;;  %v1142_v27 = vld [vmem:[%s1414_s1 + $0x218] sm:$0xff]   ;;  %v161_v48 = vld [vmem:[%s1416_s2] sm:$0x1] }
  0x19   :  { %986 = vmatpush3.bf16.msra.mxu1 %v1096_v26  ;;  %v1141_v26 = vld [vmem:[%s1414_s1 + $0x220] sm:$0xff]   ;;  %v1144_v29 = vld [vmem:[%s1414_s1 + $0x208] sm:$0xff]   ;;  %vm872_vm3 = vmand %vm870_vm1, %vm871_vm2 }
  0x1a   :  { %987 = vmatprep.subr.bf16.mxu1 %v1099_v31 }
  0x1b   :  { %966 = vmatpush3.bf16.msra.mxu0 %v1098_v30  ;;  %v1145_v30 = vld [vmem:[%s1414_s1 + $0x200] sm:$0xff]  }
  0x1c   :  { %967 = vmatprep.subr.bf16.mxu0 %v1101_v33 }
  0x1d   :  { %988 = vmatpush3.bf16.msra.mxu1 %v1100_v32 }
  0x1e   :  { %989 = vmatprep.subr.bf16.mxu1 %v1103_v36 }
  0x1f   :  { %968 = vmatpush3.bf16.msra.mxu0 %v1102_v35 }
  0x20   :  { %997 = vmatprep.subr.bf16.mxu0 %v1106_v41 }
  0x21   :  { %990 = vmatpush3.bf16.msra.mxu1 %v1105_v40 }
  0x22   :  { %1019 = vmatprep.subr.bf16.mxu1 %v1108_v45  ;;  %701 = vmatmul.mubr.bf16.vlgmr.msra.gmra.mxu0 %v187_v43 }
  0x23   :  { %998 = vmatpush3.bf16.msra.mxu0 %v1107_v47  ;;  %780 = vmatprep.mubr.bf16.mxu0 %v208_v53 }
  0x24   :  { %741 = vmatmul.mubr.bf16.vlgmr.msra.gmra.mxu1 %v209_v49  ;;  %999 = vmatprep.subr.bf16.mxu0 %v1110_v50 }
  0x25   :  { %1020 = vmatpush3.bf16.msra.mxu1 %v1109_v52  ;;  %820 = vmatprep.mubr.bf16.mxu1 %v212_v56 }
  0x26   :  { %1021 = vmatprep.subr.bf16.mxu1 %v1112_v54 }
  0x27   :  { %1000 = vmatpush3.bf16.msra.mxu0 %v1111_v55 }
  0x28   :  { %1001 = vmatprep.subr.bf16.mxu0 %v1114_v57 }
  0x29   :  { %1022 = vmatpush3.bf16.msra.mxu1 %v1113_v58 }
  0x2a   :  { %1023 = vmatprep.subr.bf16.mxu1 %v1116_v59 }
  0x2b   :  { %1002 = vmatpush3.bf16.msra.mxu0 %v1115_v60  ;;  %v873_v60 = vld [vmem:[%s1417_s3] sm:$0x1] }
  0x2c   :  { %1003 = vmatprep.subr.bf16.mxu0 %v1118_v61 }
  0x2d   :  { %1024 = vmatpush3.bf16.msra.mxu1 %v1117_v62 }
  0x2e   :  { %1025 = vmatprep.subr.bf16.mxu1 %v1120_v63 }
  0x2f   :  { %1004 = vmatpush3.bf16.msra.mxu0 %v1119_v0 }
  0x30   :  { %1005 = vmatprep.subr.bf16.mxu0 %v1122_v1 }
  0x31   :  { %1026 = vmatpush3.bf16.msra.mxu1 %v1121_v2 }
  0x32   :  { %1027 = vmatprep.subr.bf16.mxu1 %v1124_v3 }
  0x33   :  { %1006 = vmatpush3.bf16.msra.mxu0 %v1123_v4 }
  0x34   :  { %1007 = vmatprep.subr.bf16.mxu0 %v1126_v5 }
  0x35   :  { %1028 = vmatpush3.bf16.msra.mxu1 %v1125_v6 }
  0x36   :  { %1029 = vmatprep.subr.bf16.mxu1 %v1128_v7 }
  0x37   :  { %1008 = vmatpush3.bf16.msra.mxu0 %v1127_v8 }
  0x38   :  { %1009 = vmatprep.subr.bf16.mxu0 %v1130_v9 }
  0x39   :  { %1030 = vmatpush3.bf16.msra.mxu1 %v1129_v10 }
  0x3a   :  { %1031 = vmatprep.subr.bf16.mxu1 %v1132_v11 }
  0x3b   :  { %1010 = vmatpush3.bf16.msra.mxu0 %v1131_v12 }
  0x3c   :  { %1011 = vmatprep.subr.bf16.mxu0 %v1134_v13 }
  0x3d   :  { %1032 = vmatpush3.bf16.msra.mxu1 %v1133_v14 }
  0x3e   :  { %1033 = vmatprep.subr.bf16.mxu1 %v1136_v15 }
  0x3f   :  { %1012 = vmatpush3.bf16.msra.mxu0 %v1135_v16 }
  0x40   :  { %1050 = vmatprep.subr.bf16.mxu0 %v1147_v20 }
  0x41   :  { %1034 = vmatpush3.bf16.msra.mxu1 %v1137_v18 }
  0x42   :  { %781 = vmatmul.mubr.bf16.vlgmr.msra.gmra.mxu0 %v194_v17 }
  0x43   :  { %1051 = vmatpush3.bf16.msra.mxu0 %v1138_v19  ;;  %1066 = vmatprep.mubr.msk.bf16.mxu0 %vm1148_vm0, %v1147_v20 }
  0x44   :  { %821 = vmatmul.mubr.bf16.vlgmr.msra.gmra.mxu1 %v210_v21  ;;  %1052 = vmatprep.subr.bf16.mxu0 %v1147_v20 }
  0x47   :  { %1053 = vmatpush3.bf16.msra.mxu0 %v1139_v22 }
  0x48   :  { %1054 = vmatprep.subr.bf16.mxu0 %v1147_v20 }
  0x4b   :  { %1055 = vmatpush3.bf16.msra.mxu0 %v1140_v25 }
  0x4c   :  { %1056 = vmatprep.subr.bf16.mxu0 %v1147_v20 }
  0x4f   :  { %1057 = vmatpush3.bf16.msra.mxu0 %v1141_v26 }
  0x50   :  { %1058 = vmatprep.subr.bf16.mxu0 %v1147_v20 }
  0x53   :  { %1059 = vmatpush3.bf16.msra.mxu0 %v1142_v27 }
  0x54   :  { %1060 = vmatprep.subr.bf16.mxu0 %v1147_v20 }
  0x57   :  { %1061 = vmatpush3.bf16.msra.mxu0 %v1143_v28 }
  0x58   :  { %1062 = vmatprep.subr.bf16.mxu0 %v1147_v20 }
  0x5b   :  { %1063 = vmatpush3.bf16.msra.mxu0 %v1144_v29 }
  0x5c   :  { %1064 = vmatprep.subr.bf16.mxu0 %v1147_v20 }
  0x5f   :  { %1065 = vmatpush3.bf16.msra.mxu0 %v1145_v30 }
  0x62   :  { %1067 = vmatmul.mubr.bf16.vlgmr.msra.gmra.mxu0 %v226_v24 }
  0xe2   :  { %v969_v31 = vpop.f32.mrf.mxu0 }
  0xe4   :  { %v970_v32 = vpop.f32.mrf.mxu0  ;;  %v991_v33 = vpop.f32.mrf.mxu1 }
  0xe5   :  { %v971_v47 = vadd.f32 %v970_v32, %v969_v31 }
  0xe6   :  { %v972_v34 = vpop.f32.mrf.mxu0  ;;  %v992_v35 = vpop.f32.mrf.mxu1 }
  0xe7   :  { %v703_v49 = vadd.f32 %v971_v47, %v161_v48  ;;  %v993_v50 = vadd.f32 %v992_v35, %v991_v33 }
  0xe8   :  { %v973_v36 = vpop.f32.mrf.mxu0  ;;  %v994_v37 = vpop.f32.mrf.mxu1 }
  0xe9   :  { %v743_v52 = vadd.f32 %v993_v50, %v703_v49 }
  0xea   :  { %v995_v38 = vpop.f32.mrf.mxu1 }
 0x102   :  { %v1013_v39 = vpop.f32.mrf.mxu0 }
 0x104   :  { %v1014_v40 = vpop.f32.mrf.mxu0  ;;  %v1035_v41 = vpop.f32.mrf.mxu1 }
 0x105   :  { %v1015_v51 = vadd.f32 %v1014_v40, %v1013_v39 }
 0x106   :  { %v1016_v42 = vpop.f32.mrf.mxu0  ;;  %v1036_v43 = vpop.f32.mrf.mxu1 }
 0x107   :  { %v783_v53 = vadd.f32 %v1015_v51, %v743_v52  ;;  %v1037_v54 = vadd.f32 %v1036_v43, %v1035_v41 }
 0x108   :  { %v1017_v44 = vpop.f32.mrf.mxu0  ;;  %v1038_v45 = vpop.f32.mrf.mxu1 }
 0x109   :  { %v823_v55 = vadd.f32 %v1037_v54, %v783_v53 }
 0x10a   :  { %v1039_v46 = vpop.f32.mrf.mxu1 }
 0x122   :  { %v862_v56 = vpop.f32.mrf.mxu0 }
 0x123   :  { %v863_v57 = vadd.f32 %v862_v56, %v823_v55 }
 0x124   :  { %v1068_v58 = vpop.f32.mrf.mxu0 }
 0x125   :  { %v868_v59 = vmax.f32 %v863_v57, 0.0 }
 0x126   :  { %v865_v61 = vpop.f32.mrf.mxu0 }
 0x127   :  { %v869_v62 = vpack.c.bf16 %v868_v59, %v868_v59 }
 0x128   :  { %v1069_v63 = vpop.f32.mrf.mxu0 }
 0x129   :  { %v874_v0 = vsel %vm872_vm3, %v869_v62, %v873_v60 }
 0x12a   :  { %875 = vst [vmem:[%s1417_s3] sm:$0x1] %v874_v0 }

// kernel: dqn_forward.7
= control target key start
LH: loop header
LB: loop body
LE: loop exit
PB: predicated region body
PF: predicated region fallthrough
CT: control target
= control target key end

     0   :  { %v768_v2 = vmov 0   ;;  %vm141_vm0 = vcmask 523264   ;;  %s956_s0 = inlined_call_operand.vmem [shape: bf16[2,64], index: 0, kind: input, shape index: {}]   ;;  %s957_s1 = inlined_call_operand.vmem [shape: bf16[64,512], index: 1, kind: input, shape index: {}]   ;;  %s958_s2 = inlined_call_operand.vmem [shape: f32[1,512], index: 2, kind: input, shape index: {}]   ;;  %s959_s3 = inlined_call_operand.vmem [shape: bf16[512,128], index: 3, kind: input, shape index: {}]   ;;  %s960_s4 = inlined_call_operand.vmem [shape: f32[1,128], index: 4, kind: input, shape index: {}]   ;;  %s961_s5 = inlined_call_operand.hbm [shape: f32[2,128], index: 5, kind: output, shape index: {}]  }
   0x1   :  { %v690_v0 = vld [vmem:[%s957_s1 + $0x64] ss:$16 sps:$4 sm:$0xff]   ;;  %v692_v1 = vld [vmem:[%s957_s1 + $0x6c] ss:$16 sps:$4 sm:$0xff]   ;;  %177 = vmatprep.mubr.bf16.mxu0 %v768_v2  ;;  %218 = vmatprep.mubr.bf16.mxu1 %v768_v2  ;;  %v694_v3 = vld [vmem:[%s957_s1 + $0x60] ss:$16 sps:$4 sm:$0xff]  }
   0x2   :  { %153 = vmatprep.subr.bf16.mxu0 %v690_v0  ;;  %v695_v4 = vld [vmem:[%s957_s1 + $0x68] ss:$16 sps:$4 sm:$0xff]   ;;  %194 = vmatprep.subr.bf16.mxu1 %v692_v1  ;;  %v696_v5 = vld [vmem:[%s957_s1 + $0x44] ss:$16 sps:$4 sm:$0xff]   ;;  %v698_v6 = vld [vmem:[%s957_s1 + $0x4c] ss:$16 sps:$4 sm:$0xff]  }
   0x3   :  { %154 = vmatpush1.bf16.msra.mxu0 %v694_v3  ;;  %195 = vmatpush1.bf16.msra.mxu1 %v695_v4  ;;  %v700_v7 = vld [vmem:[%s957_s1 + $0x40] ss:$16 sps:$4 sm:$0xff]   ;;  %v701_v8 = vld [vmem:[%s957_s1 + $0x48] ss:$16 sps:$4 sm:$0xff]   ;;  %v702_v9 = vld [vmem:[%s957_s1 + $0x24] ss:$16 sps:$4 sm:$0xff]  }
   0x4   :  { %155 = vmatprep.subr.bf16.mxu0 %v696_v5  ;;  %196 = vmatprep.subr.bf16.mxu1 %v698_v6  ;;  %v704_v10 = vld [vmem:[%s957_s1 + $0x2c] ss:$16 sps:$4 sm:$0xff]   ;;  %v706_v11 = vld [vmem:[%s957_s1 + $0x20] ss:$16 sps:$4 sm:$0xff]   ;;  %v707_v12 = vld [vmem:[%s957_s1 + $0x28] ss:$16 sps:$4 sm:$0xff]  }
   0x5   :  { %v708_v13 = vld [vmem:[%s957_s1 + $0x4] ss:$16 sps:$4 sm:$0xff]   ;;  %v710_v14 = vld [vmem:[%s957_s1 + $0xc] ss:$16 sps:$4 sm:$0xff]   ;;  %v712_v15 = vld [vmem:[%s957_s1] ss:$16 sps:$4 sm:$0xff]  }
   0x6   :  { %v713_v16 = vld [vmem:[%s957_s1 + $0x8] ss:$16 sps:$4 sm:$0xff]   ;;  %v22_v19 = vld [vmem:[%s956_s0] sm:$0x1]  ;;  %v718_v22 = vld [vmem:[%s959_s3 + $0x70] sm:$0xff]  }
   0x7   :  { %156 = vmatpush1.bf16.msra.mxu0 %v700_v7  ;;  %197 = vmatpush1.bf16.msra.mxu1 %v701_v8  ;;  %v714_v17 = vld [vmem:[%s959_s3 + $0x78] sm:$0xff]   ;;  %v719_v23 = vld [vmem:[%s959_s3 + $0xf0] sm:$0xff]   ;;  %v722_v26 = vld [vmem:[%s959_s3 + $0x68] sm:$0xff]  }
   0x8   :  { %157 = vmatprep.subr.bf16.mxu0 %v702_v9  ;;  %198 = vmatprep.subr.bf16.mxu1 %v704_v10  ;;  %v715_v18 = vld [vmem:[%s959_s3 + $0xf8] sm:$0xff]   ;;  %v720_v24 = vld [vmem:[%s959_s3 + $0x30] sm:$0xff]   ;;  %v723_v27 = vld [vmem:[%s959_s3 + $0xe8] sm:$0xff]  }
   0x9   :  { %v716_v20 = vld [vmem:[%s959_s3 + $0x38] sm:$0xff]   ;;  %v721_v25 = vld [vmem:[%s959_s3 + $0xb0] sm:$0xff]   ;;  %v724_v28 = vld [vmem:[%s959_s3 + $0x28] sm:$0xff]  }
   0xa   :  { %v717_v21 = vld [vmem:[%s959_s3 + $0xb8] sm:$0xff]   ;;  %v725_v29 = vld [vmem:[%s959_s3 + $0xa8] sm:$0xff]   ;;  %v726_v30 = vld [vmem:[%s959_s3 + $0x60] sm:$0xff]  }
   0xb   :  { %158 = vmatpush1.bf16.msra.mxu0 %v706_v11  ;;  %199 = vmatpush1.bf16.msra.mxu1 %v707_v12  ;;  %v727_v31 = vld [vmem:[%s959_s3 + $0xe0] sm:$0xff]   ;;  %v730_v34 = vld [vmem:[%s959_s3 + $0x58] sm:$0xff]   ;;  %v734_v38 = vld [vmem:[%s959_s3 + $0x50] sm:$0xff]  }
   0xc   :  { %159 = vmatprep.subr.bf16.mxu0 %v708_v13  ;;  %200 = vmatprep.subr.bf16.mxu1 %v710_v14  ;;  %v728_v32 = vld [vmem:[%s959_s3 + $0x20] sm:$0xff]   ;;  %v731_v35 = vld [vmem:[%s959_s3 + $0xd8] sm:$0xff]   ;;  %v735_v39 = vld [vmem:[%s959_s3 + $0xd0] sm:$0xff]  }
   0xd   :  { %v729_v33 = vld [vmem:[%s959_s3 + $0xa0] sm:$0xff]   ;;  %v732_v36 = vld [vmem:[%s959_s3 + $0x18] sm:$0xff]   ;;  %v736_v40 = vld [vmem:[%s959_s3 + $0x10] sm:$0xff]  }
   0xe   :  { %v733_v37 = vld [vmem:[%s959_s3 + $0x98] sm:$0xff]   ;;  %v737_v41 = vld [vmem:[%s959_s3 + $0x90] sm:$0xff]  }
   0xf   :  { %160 = vmatpush1.bf16.msra.mxu0 %v712_v15  ;;  %201 = vmatpush1.bf16.msra.mxu1 %v713_v16 }
  0x10   :  { %644 = vmatprep.subr.bf16.mxu0 %v714_v17  ;;  %666 = vmatprep.subr.bf16.mxu1 %v715_v18 }
  0x12   :  { %609 = vmatmul.mubr.msk.bf16.vlgmr.msra.gmra.mxu0 %vm141_vm0, %v22_v19  ;;  %610 = vmatmul.mubr.msk.bf16.vlgmr.msra.gmra.mxu1 %vm141_vm0, %v22_v19 }
  0x13   :  { %645 = vmatpush3.bf16.msra.mxu0 %v716_v20  ;;  %667 = vmatpush3.bf16.msra.mxu1 %v717_v21 }
  0x14   :  { %646 = vmatprep.subr.bf16.mxu0 %v718_v22  ;;  %668 = vmatprep.subr.bf16.mxu1 %v719_v23 }
  0x17   :  { %647 = vmatpush3.bf16.msra.mxu0 %v720_v24  ;;  %669 = vmatpush3.bf16.msra.mxu1 %v721_v25 }
  0x18   :  { %648 = vmatprep.subr.bf16.mxu0 %v722_v26  ;;  %670 = vmatprep.subr.bf16.mxu1 %v723_v27 }
  0x1b   :  { %649 = vmatpush3.bf16.msra.mxu0 %v724_v28  ;;  %671 = vmatpush3.bf16.msra.mxu1 %v725_v29 }
  0x1c   :  { %650 = vmatprep.subr.bf16.mxu0 %v726_v30  ;;  %672 = vmatprep.subr.bf16.mxu1 %v727_v31 }
  0x1f   :  { %651 = vmatpush3.bf16.msra.mxu0 %v728_v32  ;;  %673 = vmatpush3.bf16.msra.mxu1 %v729_v33 }
  0x20   :  { %652 = vmatprep.subr.bf16.mxu0 %v730_v34  ;;  %674 = vmatprep.subr.bf16.mxu1 %v731_v35 }
  0x23   :  { %653 = vmatpush3.bf16.msra.mxu0 %v732_v36  ;;  %675 = vmatpush3.bf16.msra.mxu1 %v733_v37 }
  0x24   :  { %654 = vmatprep.subr.bf16.mxu0 %v734_v38  ;;  %676 = vmatprep.subr.bf16.mxu1 %v735_v39 }
  0x27   :  { %655 = vmatpush3.bf16.msra.mxu0 %v736_v40  ;;  %677 = vmatpush3.bf16.msra.mxu1 %v737_v41 }
  0x28   :  { %10 = vsyncpa [#allocation3], 0  ;;  %v738_v42 = vld [vmem:[%s959_s3 + $0x48] sm:$0xff]   ;;  %v742_v46 = vld [vmem:[%s959_s3 + $0x40] sm:$0xff]   ;;  %v41_v50 = vlaneseq  ;;  %s769_s0 = smov [#allocation2]  }
  0x29   :  { %v739_v43 = vld [vmem:[%s959_s3 + $0xc8] sm:$0xff]   ;;  %656 = vmatprep.subr.bf16.mxu0 %v738_v42  ;;  %v743_v47 = vld [vmem:[%s959_s3 + $0xc0] sm:$0xff]   ;;  %s585_s13 = sshll.u32 %s769_s0, 4  ;;  %s586_s13 = int_to_ptr.vmem [resolvable:$true] %s585_s13 }
  0x2a   :  { %v740_v44 = vld [vmem:[%s959_s3 + $0x8] sm:$0xff]   ;;  %678 = vmatprep.subr.bf16.mxu1 %v739_v43  ;;  %v744_v48 = vld [vmem:[%s959_s3] sm:$0xff]   ;;  %v42_v51 = vshrl.u32 %v41_v50, 7  ;;  %s746_s14 = scalar_lea.vmem %s586_s13, 32  ;;  %p751_p1 = scmp.lt.s32.totalorder %s586_s13, %s586_s13 }
  0x2b   :  { %v741_v45 = vld [vmem:[%s959_s3 + $0x88] sm:$0xff]   ;;  %657 = vmatpush3.bf16.msra.mxu0 %v740_v44  ;;  %v745_v49 = vld [vmem:[%s959_s3 + $0x80] sm:$0xff]   ;;  %p747_p0 = scmp.ne.s32.totalorder %s586_s13, %s746_s14  ;;  %p752_p2 = scmp.lt.s32.totalorder %s746_s14, %s746_s14 }
  0x2c   :  { %679 = vmatpush3.bf16.msra.mxu1 %v741_v45  ;;  %658 = vmatprep.subr.bf16.mxu0 %v742_v46  ;;  %v43_v52 = vsub.s32 0, %v42_v51  ;;  %v51_v53 = vsub.s32 2, %v42_v51  ;;  %v39_v54 = vld [vmem:[%s958_s2] sm:$0xf]  ;;  %v47_v55 = vsub.s32 1, %v42_v51  ;;  %v55_v56 = vsub.s32 3, %v42_v51 }
  0x2d   :  { %680 = vmatprep.subr.bf16.mxu1 %v743_v47  ;;  %v611_v19 = vld [vmem:[%s960_s4] ss:$0 sm:$0xff]  ;;  %p753_p3 = por %p752_p2, %p751_p1 }
  0x2e   :  { %v44_v57 = vrot.slane %v39_v54, %v43_v52  ;;  %v52_v58 = vrot.slane %v39_v54, %v51_v53  ;;  %v48_v59 = vrot.slane %v39_v54, %v47_v55  ;;  %v56_v60 = vrot.slane %v39_v54, %v55_v56 }
  0x2f   :  { %659 = vmatpush3.bf16.msra.mxu0 %v744_v48  ;;  %p754_p4 = pnand %p753_p3, %p747_p0 }
  0x30   :  { %681 = vmatpush3.bf16.msra.mxu1 %v745_v49 }
  0xd2   :  { %v179_v61 = vpop.f32.mrf.mxu0  ;;  %v220_v62 = vpop.f32.mrf.mxu1 }
  0xd3   :  { %v180_v63 = vadd.f32 %v179_v61, %v44_v57  ;;  %v221_v0 = vadd.f32 %v220_v62, %v52_v58 }
  0xd4   :  { %v181_v1 = vpop.f32.mrf.mxu0  ;;  %v222_v2 = vpop.f32.mrf.mxu1 }
  0xd5   :  { %v229_v3 = vmax.f32 %v221_v0, 0.0  ;;  %v182_v4 = vadd.f32 %v181_v1, %v48_v59  ;;  %v223_v5 = vadd.f32 %v222_v2, %v56_v60  ;;  %v227_v6 = vmax.f32 %v180_v63, 0.0 }
  0xd6   :  { %v183_v7 = vpop.f32.mrf.mxu0  ;;  %v224_v8 = vpop.f32.mrf.mxu1 }
  0xd7   :  { %v228_v9 = vmax.f32 %v182_v4, 0.0  ;;  %v230_v10 = vmax.f32 %v223_v5, 0.0  ;;  %v233_v11 = vpack.c.bf16 %v229_v3, %v229_v3  ;;  %v231_v16 = vpack.c.bf16 %v227_v6, %v227_v6 }
  0xd8   :  { %v184_v12 = vpop.f32.mrf.mxu0  ;;  %v225_v13 = vpop.f32.mrf.mxu1 }
  0xd9   :  { %v232_v14 = vpack.c.bf16 %v228_v9, %v228_v9  ;;  %v234_v15 = vpack.c.bf16 %v230_v10, %v230_v10 }
  0xdb   :  { %530 = vmatprep.mubr.bf16.mxu0 %v232_v14  ;;  %570 = vmatprep.mubr.bf16.mxu1 %v234_v15 }
  0xdc   :  { %531 = vmatmul.mubr.bf16.vlgmr.msra.gmra.mxu0 %v231_v16  ;;  %571 = vmatmul.mubr.bf16.vlgmr.msra.gmra.mxu1 %v233_v11 }
 0x19c   :  { %v660_v17 = vpop.f32.mrf.mxu0  ;;  %v682_v18 = vpop.f32.mrf.mxu1 }
 0x19e   :  { %v661_v20 = vpop.f32.mrf.mxu0  ;;  %v683_v21 = vpop.f32.mrf.mxu1 }
 0x19f   :  { %v662_v22 = vadd.f32 %v661_v20, %v660_v17  ;;  %v684_v26 = vadd.f32 %v683_v21, %v682_v18 }
 0x1a0   :  { %v663_v23 = vpop.f32.mrf.mxu0  ;;  %v685_v24 = vpop.f32.mrf.mxu1 }
 0x1a1   :  { %v533_v25 = vadd.f32 %v662_v22, %v611_v19 }
 0x1a2   :  { %v664_v27 = vpop.f32.mrf.mxu0  ;;  %v686_v28 = vpop.f32.mrf.mxu1 }
 0x1a3   :  { %v573_v29 = vadd.f32 %v684_v26, %v533_v25 }
 0x1a5   :  { %578 = vst [vmem:[#allocation2] sm:$0x3] %v573_v29 }
 0x1a6   :  { %757 = shalt.err (!%p754_p4)
}
 0x1a7   :  { %588 = dma.vmem_to_hbm [thread:$0]  %s586_s13, 32, %s961_s5, [#allocation3]  }
 0x1a8   :  { %766 = dma.done.wait [#allocation3], 32  }
 0x1a9   :  { %767 = vsyncadd [#allocation3], 4294967264 }
 0x1aa   :  { %592 = vsyncpa [#allocation3], 1 }

</bundles_post_ra>
